<compile_context>
chip_gen: v6e
topology: v6e:2x2x1
jax: 0.10.0
libtpu: 0.0.40
codegen_flags: <defaults>
</compile_context>

<pallas_src>
import jax
import jax.numpy as jnp
from jax import lax
from jax.experimental import pallas as pl
from jax.experimental.pallas import tpu as pltpu


def _make_rcab_kernel(H, W, C):
    HW = H * W

    def kernel(x_ref, w1_ref, b1_ref, w2_ref, b2_ref,
               wd_ref, bd_ref, wu_ref, bu_ref, o_ref):
        # x_ref / o_ref blocks: (1, C, H*W); weights already reshaped in wrapper.
        x = x_ref[0]                                            # (C, HW) f32

        # Hoisted pixel-index iotas (shared by both convs).
        p = lax.broadcasted_iota(jnp.int32, (C, HW), 1)         # flattened pixel id
        if (W & (W - 1)) == 0:
            col = jnp.bitwise_and(p, W - 1)                     # j = p % W (power-of-2 W)
        else:
            col = p % W                                         # TODO(synk): check int-mod lowering for non-pow2 W

        def tap(img, dy, dx):
            # img shifted by (dy, dx) pixels with zero padding outside the image.
            k = dy * W + dx
            shifted = img if k == 0 else pltpu.roll(img, shift=(-k) % HW, axis=1)
            conds = []
            if dy > 0:
                conds.append(p < HW - dy * W)
            elif dy < 0:
                conds.append(p >= -dy * W)
            if dx > 0:
                conds.append(col < W - dx)
            elif dx < 0:
                conds.append(col >= -dx)
            for cond in conds:
                shifted = jnp.where(cond, shifted, 0.0)
            return shifted

        def conv3x3(img, wm_ref, b_ref, dil):
            # Fused im2col: one K = 9*C matmul instead of nine K = C matmuls.
            taps = []
            for dy in (-dil, 0, dil):          # kh = 0, 1, 2
                for dx in (-dil, 0, dil):      # kw = 0, 1, 2
                    taps.append(tap(img, dy, dx).astype(jnp.bfloat16))
            patch = jnp.concatenate(taps, axis=0)               # (9C, HW) bf16, aligned offsets
            out = jnp.dot(wm_ref[...], patch,                   # (C, 9C) @ (9C, HW)
                          preferred_element_type=jnp.float32)   # (C, HW) f32 accum
            return out + b_ref[...]                             # + (C, 1) bias

        # ---- body: conv(dil=1) -> ReLU -> conv(dil=2) ---------------------------
        h = jnp.maximum(conv3x3(x, w1_ref, b1_ref, 1), 0.0)
        res = conv3x3(h, w2_ref, b2_ref, 2)

        # ---- CALayer (squeeze-excite) --------------------------------------------
        y = jnp.mean(res, axis=1, keepdims=True)                # (C, 1) global avg pool
        z = jnp.dot(wd_ref[...], y,
                    preferred_element_type=jnp.float32) + bd_ref[...]
        z = jnp.maximum(z, 0.0)                                 # (Cr, 1)
        s = jax.nn.sigmoid(
            jnp.dot(wu_ref[...], z,
                    preferred_element_type=jnp.float32) + bu_ref[...])   # (C, 1)

        # ---- scale + residual, lane-dense store ----------------------------------
        o_ref[0] = (res * s + x).astype(o_ref.dtype)

    return kernel


def rcab(x, w1, b1, w2, b2, wd, bd, wu, bu):
    """RCAB forward.

    x : (N, C, H, W) float32 (PyTorch NCHW layout)
    w1, w2 : (C, C, 3, 3)   (PyTorch OIHW conv weights)
    b1, b2 : (C,)
    wd : (C//r, C), bd : (C//r,)   (1x1 squeeze conv)
    wu : (C, C//r), bu : (C,)      (1x1 excite conv)
    """
    N, C, H, W = x.shape
    HW = H * W
    Cr = wd.shape[0]

    # Lane-dense activations: NCHW -> (N, C, H*W) (free bit-identical reshape).
    x_flat = x.reshape(N, C, HW)
    # (Cout, Cin, kh, kw) -> (Cout, kh, kw, Cin) -> (Cout, 9*Cin), bf16 MXU operands.
    w1m = jnp.transpose(w1, (0, 2, 3, 1)).reshape(C, 9 * C).astype(jnp.bfloat16)
    w2m = jnp.transpose(w2, (0, 2, 3, 1)).reshape(C, 9 * C).astype(jnp.bfloat16)
    b1c = b1.reshape(C, 1).astype(jnp.float32)
    b2c = b2.reshape(C, 1).astype(jnp.float32)
    wdc = wd.astype(jnp.float32)                 # (Cr, C)
    bdc = bd.reshape(Cr, 1).astype(jnp.float32)
    wuc = wu.astype(jnp.float32)                 # (C, Cr)
    buc = bu.reshape(C, 1).astype(jnp.float32)

    flops = N * (2 * 2 * C * (9 * C) * HW + 2 * 2 * Cr * C)
    bytes_accessed = (2 * x.size * 4                      # x in + out
                      + 2 * C * 9 * C * 2                 # conv weights (bf16)
                      + (2 * C + Cr * C + Cr + C * Cr + C) * 4)
    cost = pl.CostEstimate(flops=flops, transcendentals=N * C,
                           bytes_accessed=bytes_accessed)

    kernel = _make_rcab_kernel(H, W, C)
    out_flat = pl.pallas_call(
        kernel,
        out_shape=jax.ShapeDtypeStruct((N, C, HW), x.dtype),
        grid_spec=pltpu.PrefetchScalarGridSpec(
            num_scalar_prefetch=0,
            grid=(N,),
            in_specs=[
                pl.BlockSpec((1, C, HW), lambda n: (n, 0, 0)),   # x (lane-dense)
                pl.BlockSpec((C, 9 * C), lambda n: (0, 0)),      # w1 fused (bf16)
                pl.BlockSpec((C, 1),     lambda n: (0, 0)),      # b1
                pl.BlockSpec((C, 9 * C), lambda n: (0, 0)),      # w2 fused (bf16)
                pl.BlockSpec((C, 1),     lambda n: (0, 0)),      # b2
                pl.BlockSpec((Cr, C),    lambda n: (0, 0)),      # wd (squeeze)
                pl.BlockSpec((Cr, 1),    lambda n: (0, 0)),      # bd
                pl.BlockSpec((C, Cr),    lambda n: (0, 0)),      # wu (excite)
                pl.BlockSpec((C, 1),     lambda n: (0, 0)),      # bu
            ],
            out_specs=pl.BlockSpec((1, C, HW), lambda n: (n, 0, 0)),
        ),
        compiler_params=pltpu.CompilerParams(
            dimension_semantics=("parallel",)),
        cost_estimate=cost,
    )(x_flat, w1m, b1c, w2m, b2c, wdc, bdc, wuc, buc)

    return out_flat.reshape(N, C, H, W)


def rcab_reference(x, w1, b1, w2, b2, wd, bd, wu, bu):
    """Pure-JAX (f32) reference matching the PyTorch module semantics."""
    def conv(inp, w, b, dil):
        out = lax.conv_general_dilated(
            inp, w, window_strides=(1, 1),
            padding=[(dil, dil), (dil, dil)],
            rhs_dilation=(dil, dil),
            dimension_numbers=("NCHW", "OIHW", "NCHW"))
        return out + b.reshape(1, -1, 1, 1)

    h = jax.nn.relu(conv(x, w1, b1, 1))
    res = conv(h, w2, b2, 2)
    y = jnp.mean(res, axis=(2, 3))                                  # (N, C)
    z = jax.nn.relu(jnp.einsum('nc,kc->nk', y, wd) + bd)            # (N, Cr)
    s = jax.nn.sigmoid(jnp.einsum('nk,ck->nc', z, wu) + bu)         # (N, C)
    return res * s[:, :, None, None] + x


if __name__ == "__main__":
    # Shapes consistent with RCAB(conv, n_feat=32, kernel_size=3, reduction=16)
    N, C, H, W = 2, 32, 16, 16
    reduction = 16
    Cr = C // reduction
    scale = 0.05

    key = jax.random.PRNGKey(0)
    ks = jax.random.split(key, 10)
    x = jax.random.normal(ks[0], (N, C, H, W), jnp.float32)          # NCHW like PyTorch

    # Synthetic parameters in PyTorch layouts.
    w1 = scale * jax.random.normal(ks[1], (C, C, 3, 3), jnp.float32)
    b1 = scale * jax.random.normal(ks[2], (C,), jnp.float32)
    w2 = scale * jax.random.normal(ks[3], (C, C, 3, 3), jnp.float32)
    b2 = scale * jax.random.normal(ks[4], (C,), jnp.float32)
    wd = scale * jax.random.normal(ks[5], (Cr, C), jnp.float32)      # squeeze 1x1
    bd = scale * jax.random.normal(ks[6], (Cr,), jnp.float32)
    wu = scale * jax.random.normal(ks[7], (C, Cr), jnp.float32)      # excite 1x1
    bu = scale * jax.random.normal(ks[8], (C,), jnp.float32)

    out = jax.block_until_ready(rcab(x, w1, b1, w2, b2, wd, bd, wu, bu))

    expected = rcab_reference(x, w1, b1, w2, b2, wd, bd, wu, bu)
    max_err = float(jnp.max(jnp.abs(out - expected)))
    assert out.shape == (N, C, H, W)
    # bf16 MXU operands vs. f32 reference -> slightly relaxed tolerance.
    assert jnp.allclose(out, expected, rtol=5e-2, atol=5e-2), f"max_err={max_err}"

    print("KERNEL_OK")
</pallas_src>

<mosaic_0001>
module attributes {stable_mosaic.version = 11 : i64} {
  func.func @kernel(%arg0: i32, %arg1: memref<1x32x256xf32, #tpu.memory_space<vmem>>, %arg2: memref<32x288xbf16, #tpu.memory_space<vmem>>, %arg3: memref<32x1xf32, #tpu.memory_space<vmem>>, %arg4: memref<32x288xbf16, #tpu.memory_space<vmem>>, %arg5: memref<32x1xf32, #tpu.memory_space<vmem>>, %arg6: memref<2x32xf32, #tpu.memory_space<vmem>>, %arg7: memref<2x1xf32, #tpu.memory_space<vmem>>, %arg8: memref<32x2xf32, #tpu.memory_space<vmem>>, %arg9: memref<32x1xf32, #tpu.memory_space<vmem>>, %arg10: memref<1x32x256xf32, #tpu.memory_space<vmem>>) attributes {dimension_semantics = [#tpu.dimension_semantics<parallel>], iteration_bounds = array<i64: 2>, scalar_prefetch = 0 : i64, scratch_operands = 0 : i64, tpu.core_type = #tpu.core_type<tc>, window_params = [{transform_indices = @transform_0, window_bounds = array<i64: 1, 32, 256>}, {pipeline_mode = #tpu.pipeline_mode<synchronous>, transform_indices = @transform_1, window_bounds = array<i64: 32, 288>}, {pipeline_mode = #tpu.pipeline_mode<synchronous>, transform_indices = @transform_2, window_bounds = array<i64: 32, 1>}, {pipeline_mode = #tpu.pipeline_mode<synchronous>, transform_indices = @transform_3, window_bounds = array<i64: 32, 288>}, {pipeline_mode = #tpu.pipeline_mode<synchronous>, transform_indices = @transform_4, window_bounds = array<i64: 32, 1>}, {pipeline_mode = #tpu.pipeline_mode<synchronous>, transform_indices = @transform_5, window_bounds = array<i64: 2, 32>}, {pipeline_mode = #tpu.pipeline_mode<synchronous>, transform_indices = @transform_6, window_bounds = array<i64: 2, 1>}, {pipeline_mode = #tpu.pipeline_mode<synchronous>, transform_indices = @transform_7, window_bounds = array<i64: 32, 2>}, {pipeline_mode = #tpu.pipeline_mode<synchronous>, transform_indices = @transform_8, window_bounds = array<i64: 32, 1>}, {transform_indices = @transform_9, window_bounds = array<i64: 1, 32, 256>}]} {
    %c0 = arith.constant 0 : index
    %c0_0 = arith.constant 0 : index
    %c0_1 = arith.constant 0 : index
    %0 = vector.load %arg1[%c0, %c0_0, %c0_1] : memref<1x32x256xf32, #tpu.memory_space<vmem>>, vector<1x32x256xf32>
    %1 = vector.shape_cast %0 : vector<1x32x256xf32> to vector<32x256xf32>
    %2 = tpu.iota {dimensions = array<i32: 1>} : vector<32x256xi32>
    %c15_i32 = arith.constant 15 : i32
    %3 = vector.broadcast %c15_i32 : i32 to vector<32x256xi32>
    %4 = arith.andi %2, %3 : vector<32x256xi32>
    %c17_i32 = arith.constant 17 : i32
    %5 = tpu.dynamic_rotate %1 by %c17_i32 dim 1 : vector<32x256xf32>, i32 -> vector<32x256xf32>
    %c16_i32 = arith.constant 16 : i32
    %6 = vector.broadcast %c16_i32 : i32 to vector<32x256xi32>
    %7 = arith.cmpi sge, %2, %6 : vector<32x256xi32>
    %c1_i32 = arith.constant 1 : i32
    %8 = vector.broadcast %c1_i32 : i32 to vector<32x256xi32>
    %9 = arith.cmpi sge, %4, %8 : vector<32x256xi32>
    %cst = arith.constant 0.000000e+00 : f32
    %10 = vector.broadcast %cst : f32 to vector<32x256xf32>
    %11 = arith.select %7, %5, %10 : vector<32x256xi1>, vector<32x256xf32>
    %cst_2 = arith.constant 0.000000e+00 : f32
    %12 = vector.broadcast %cst_2 : f32 to vector<32x256xf32>
    %13 = arith.select %9, %11, %12 : vector<32x256xi1>, vector<32x256xf32>
    %14 = arith.truncf %13 : vector<32x256xf32> to vector<32x256xbf16>
    %c16_i32_3 = arith.constant 16 : i32
    %15 = tpu.dynamic_rotate %1 by %c16_i32_3 dim 1 : vector<32x256xf32>, i32 -> vector<32x256xf32>
    %c16_i32_4 = arith.constant 16 : i32
    %16 = vector.broadcast %c16_i32_4 : i32 to vector<32x256xi32>
    %17 = arith.cmpi sge, %2, %16 : vector<32x256xi32>
    %cst_5 = arith.constant 0.000000e+00 : f32
    %18 = vector.broadcast %cst_5 : f32 to vector<32x256xf32>
    %19 = arith.select %17, %15, %18 : vector<32x256xi1>, vector<32x256xf32>
    %20 = arith.truncf %19 : vector<32x256xf32> to vector<32x256xbf16>
    %c15_i32_6 = arith.constant 15 : i32
    %21 = tpu.dynamic_rotate %1 by %c15_i32_6 dim 1 : vector<32x256xf32>, i32 -> vector<32x256xf32>
    %c16_i32_7 = arith.constant 16 : i32
    %22 = vector.broadcast %c16_i32_7 : i32 to vector<32x256xi32>
    %23 = arith.cmpi sge, %2, %22 : vector<32x256xi32>
    %c15_i32_8 = arith.constant 15 : i32
    %24 = vector.broadcast %c15_i32_8 : i32 to vector<32x256xi32>
    %25 = arith.cmpi slt, %4, %24 : vector<32x256xi32>
    %cst_9 = arith.constant 0.000000e+00 : f32
    %26 = vector.broadcast %cst_9 : f32 to vector<32x256xf32>
    %27 = arith.select %23, %21, %26 : vector<32x256xi1>, vector<32x256xf32>
    %cst_10 = arith.constant 0.000000e+00 : f32
    %28 = vector.broadcast %cst_10 : f32 to vector<32x256xf32>
    %29 = arith.select %25, %27, %28 : vector<32x256xi1>, vector<32x256xf32>
    %30 = arith.truncf %29 : vector<32x256xf32> to vector<32x256xbf16>
    %c1_i32_11 = arith.constant 1 : i32
    %31 = tpu.dynamic_rotate %1 by %c1_i32_11 dim 1 : vector<32x256xf32>, i32 -> vector<32x256xf32>
    %c1_i32_12 = arith.constant 1 : i32
    %32 = vector.broadcast %c1_i32_12 : i32 to vector<32x256xi32>
    %33 = arith.cmpi sge, %4, %32 : vector<32x256xi32>
    %cst_13 = arith.constant 0.000000e+00 : f32
    %34 = vector.broadcast %cst_13 : f32 to vector<32x256xf32>
    %35 = arith.select %33, %31, %34 : vector<32x256xi1>, vector<32x256xf32>
    %36 = arith.truncf %35 : vector<32x256xf32> to vector<32x256xbf16>
    %37 = arith.truncf %1 : vector<32x256xf32> to vector<32x256xbf16>
    %c255_i32 = arith.constant 255 : i32
    %38 = tpu.dynamic_rotate %1 by %c255_i32 dim 1 : vector<32x256xf32>, i32 -> vector<32x256xf32>
    %c15_i32_14 = arith.constant 15 : i32
    %39 = vector.broadcast %c15_i32_14 : i32 to vector<32x256xi32>
    %40 = arith.cmpi slt, %4, %39 : vector<32x256xi32>
    %cst_15 = arith.constant 0.000000e+00 : f32
    %41 = vector.broadcast %cst_15 : f32 to vector<32x256xf32>
    %42 = arith.select %40, %38, %41 : vector<32x256xi1>, vector<32x256xf32>
    %43 = arith.truncf %42 : vector<32x256xf32> to vector<32x256xbf16>
    %c241_i32 = arith.constant 241 : i32
    %44 = tpu.dynamic_rotate %1 by %c241_i32 dim 1 : vector<32x256xf32>, i32 -> vector<32x256xf32>
    %c240_i32 = arith.constant 240 : i32
    %45 = vector.broadcast %c240_i32 : i32 to vector<32x256xi32>
    %46 = arith.cmpi slt, %2, %45 : vector<32x256xi32>
    %c1_i32_16 = arith.constant 1 : i32
    %47 = vector.broadcast %c1_i32_16 : i32 to vector<32x256xi32>
    %48 = arith.cmpi sge, %4, %47 : vector<32x256xi32>
    %cst_17 = arith.constant 0.000000e+00 : f32
    %49 = vector.broadcast %cst_17 : f32 to vector<32x256xf32>
    %50 = arith.select %46, %44, %49 : vector<32x256xi1>, vector<32x256xf32>
    %cst_18 = arith.constant 0.000000e+00 : f32
    %51 = vector.broadcast %cst_18 : f32 to vector<32x256xf32>
    %52 = arith.select %48, %50, %51 : vector<32x256xi1>, vector<32x256xf32>
    %53 = arith.truncf %52 : vector<32x256xf32> to vector<32x256xbf16>
    %c240_i32_19 = arith.constant 240 : i32
    %54 = tpu.dynamic_rotate %1 by %c240_i32_19 dim 1 : vector<32x256xf32>, i32 -> vector<32x256xf32>
    %c240_i32_20 = arith.constant 240 : i32
    %55 = vector.broadcast %c240_i32_20 : i32 to vector<32x256xi32>
    %56 = arith.cmpi slt, %2, %55 : vector<32x256xi32>
    %cst_21 = arith.constant 0.000000e+00 : f32
    %57 = vector.broadcast %cst_21 : f32 to vector<32x256xf32>
    %58 = arith.select %56, %54, %57 : vector<32x256xi1>, vector<32x256xf32>
    %59 = arith.truncf %58 : vector<32x256xf32> to vector<32x256xbf16>
    %c239_i32 = arith.constant 239 : i32
    %60 = tpu.dynamic_rotate %1 by %c239_i32 dim 1 : vector<32x256xf32>, i32 -> vector<32x256xf32>
    %c240_i32_22 = arith.constant 240 : i32
    %61 = vector.broadcast %c240_i32_22 : i32 to vector<32x256xi32>
    %62 = arith.cmpi slt, %2, %61 : vector<32x256xi32>
    %c15_i32_23 = arith.constant 15 : i32
    %63 = vector.broadcast %c15_i32_23 : i32 to vector<32x256xi32>
    %64 = arith.cmpi slt, %4, %63 : vector<32x256xi32>
    %cst_24 = arith.constant 0.000000e+00 : f32
    %65 = vector.broadcast %cst_24 : f32 to vector<32x256xf32>
    %66 = arith.select %62, %60, %65 : vector<32x256xi1>, vector<32x256xf32>
    %cst_25 = arith.constant 0.000000e+00 : f32
    %67 = vector.broadcast %cst_25 : f32 to vector<32x256xf32>
    %68 = arith.select %64, %66, %67 : vector<32x256xi1>, vector<32x256xf32>
    %69 = arith.truncf %68 : vector<32x256xf32> to vector<32x256xbf16>
    %70 = tpu.concatenate %14, %20, %30, %36, %37, %43, %53, %59, %69 in 0 : vector<32x256xbf16>, vector<32x256xbf16>, vector<32x256xbf16>, vector<32x256xbf16>, vector<32x256xbf16>, vector<32x256xbf16>, vector<32x256xbf16>, vector<32x256xbf16>, vector<32x256xbf16> -> vector<288x256xbf16>
    %c0_26 = arith.constant 0 : index
    %c0_27 = arith.constant 0 : index
    %71 = vector.load %arg2[%c0_26, %c0_27] : memref<32x288xbf16, #tpu.memory_space<vmem>>, vector<32x288xbf16>
    %cst_28 = arith.constant dense<0.000000e+00> : vector<32x256xf32>
    %72 = tpu.matmul %71, %70, %cst_28 {dimension_numbers = #tpu.dot_dimension_numbers<[1], [0], [0], [1], [0, 0, 1, 1], [], []>} : vector<32x288xbf16>, vector<288x256xbf16>, vector<32x256xf32> -> vector<32x256xf32>
    %c0_29 = arith.constant 0 : index
    %c0_30 = arith.constant 0 : index
    %73 = vector.load %arg3[%c0_29, %c0_30] : memref<32x1xf32, #tpu.memory_space<vmem>>, vector<32x1xf32>
    %74 = vector.broadcast %73 : vector<32x1xf32> to vector<32x256xf32>
    %75 = arith.addf %72, %74 : vector<32x256xf32>
    %cst_31 = arith.constant 0.000000e+00 : f32
    %76 = vector.broadcast %cst_31 : f32 to vector<32x256xf32>
    %77 = arith.maximumf %75, %76 : vector<32x256xf32>
    %c34_i32 = arith.constant 34 : i32
    %78 = tpu.dynamic_rotate %77 by %c34_i32 dim 1 : vector<32x256xf32>, i32 -> vector<32x256xf32>
    %c32_i32 = arith.constant 32 : i32
    %79 = vector.broadcast %c32_i32 : i32 to vector<32x256xi32>
    %80 = arith.cmpi sge, %2, %79 : vector<32x256xi32>
    %c2_i32 = arith.constant 2 : i32
    %81 = vector.broadcast %c2_i32 : i32 to vector<32x256xi32>
    %82 = arith.cmpi sge, %4, %81 : vector<32x256xi32>
    %cst_32 = arith.constant 0.000000e+00 : f32
    %83 = vector.broadcast %cst_32 : f32 to vector<32x256xf32>
    %84 = arith.select %80, %78, %83 : vector<32x256xi1>, vector<32x256xf32>
    %cst_33 = arith.constant 0.000000e+00 : f32
    %85 = vector.broadcast %cst_33 : f32 to vector<32x256xf32>
    %86 = arith.select %82, %84, %85 : vector<32x256xi1>, vector<32x256xf32>
    %87 = arith.truncf %86 : vector<32x256xf32> to vector<32x256xbf16>
    %c32_i32_34 = arith.constant 32 : i32
    %88 = tpu.dynamic_rotate %77 by %c32_i32_34 dim 1 : vector<32x256xf32>, i32 -> vector<32x256xf32>
    %c32_i32_35 = arith.constant 32 : i32
    %89 = vector.broadcast %c32_i32_35 : i32 to vector<32x256xi32>
    %90 = arith.cmpi sge, %2, %89 : vector<32x256xi32>
    %cst_36 = arith.constant 0.000000e+00 : f32
    %91 = vector.broadcast %cst_36 : f32 to vector<32x256xf32>
    %92 = arith.select %90, %88, %91 : vector<32x256xi1>, vector<32x256xf32>
    %93 = arith.truncf %92 : vector<32x256xf32> to vector<32x256xbf16>
    %c30_i32 = arith.constant 30 : i32
    %94 = tpu.dynamic_rotate %77 by %c30_i32 dim 1 : vector<32x256xf32>, i32 -> vector<32x256xf32>
    %c32_i32_37 = arith.constant 32 : i32
    %95 = vector.broadcast %c32_i32_37 : i32 to vector<32x256xi32>
    %96 = arith.cmpi sge, %2, %95 : vector<32x256xi32>
    %c14_i32 = arith.constant 14 : i32
    %97 = vector.broadcast %c14_i32 : i32 to vector<32x256xi32>
    %98 = arith.cmpi slt, %4, %97 : vector<32x256xi32>
    %cst_38 = arith.constant 0.000000e+00 : f32
    %99 = vector.broadcast %cst_38 : f32 to vector<32x256xf32>
    %100 = arith.select %96, %94, %99 : vector<32x256xi1>, vector<32x256xf32>
    %cst_39 = arith.constant 0.000000e+00 : f32
    %101 = vector.broadcast %cst_39 : f32 to vector<32x256xf32>
    %102 = arith.select %98, %100, %101 : vector<32x256xi1>, vector<32x256xf32>
    %103 = arith.truncf %102 : vector<32x256xf32> to vector<32x256xbf16>
    %c2_i32_40 = arith.constant 2 : i32
    %104 = tpu.dynamic_rotate %77 by %c2_i32_40 dim 1 : vector<32x256xf32>, i32 -> vector<32x256xf32>
    %c2_i32_41 = arith.constant 2 : i32
    %105 = vector.broadcast %c2_i32_41 : i32 to vector<32x256xi32>
    %106 = arith.cmpi sge, %4, %105 : vector<32x256xi32>
    %cst_42 = arith.constant 0.000000e+00 : f32
    %107 = vector.broadcast %cst_42 : f32 to vector<32x256xf32>
    %108 = arith.select %106, %104, %107 : vector<32x256xi1>, vector<32x256xf32>
    %109 = arith.truncf %108 : vector<32x256xf32> to vector<32x256xbf16>
    %110 = arith.truncf %77 : vector<32x256xf32> to vector<32x256xbf16>
    %c254_i32 = arith.constant 254 : i32
    %111 = tpu.dynamic_rotate %77 by %c254_i32 dim 1 : vector<32x256xf32>, i32 -> vector<32x256xf32>
    %c14_i32_43 = arith.constant 14 : i32
    %112 = vector.broadcast %c14_i32_43 : i32 to vector<32x256xi32>
    %113 = arith.cmpi slt, %4, %112 : vector<32x256xi32>
    %cst_44 = arith.constant 0.000000e+00 : f32
    %114 = vector.broadcast %cst_44 : f32 to vector<32x256xf32>
    %115 = arith.select %113, %111, %114 : vector<32x256xi1>, vector<32x256xf32>
    %116 = arith.truncf %115 : vector<32x256xf32> to vector<32x256xbf16>
    %c226_i32 = arith.constant 226 : i32
    %117 = tpu.dynamic_rotate %77 by %c226_i32 dim 1 : vector<32x256xf32>, i32 -> vector<32x256xf32>
    %c224_i32 = arith.constant 224 : i32
    %118 = vector.broadcast %c224_i32 : i32 to vector<32x256xi32>
    %119 = arith.cmpi slt, %2, %118 : vector<32x256xi32>
    %c2_i32_45 = arith.constant 2 : i32
    %120 = vector.broadcast %c2_i32_45 : i32 to vector<32x256xi32>
    %121 = arith.cmpi sge, %4, %120 : vector<32x256xi32>
    %cst_46 = arith.constant 0.000000e+00 : f32
    %122 = vector.broadcast %cst_46 : f32 to vector<32x256xf32>
    %123 = arith.select %119, %117, %122 : vector<32x256xi1>, vector<32x256xf32>
    %cst_47 = arith.constant 0.000000e+00 : f32
    %124 = vector.broadcast %cst_47 : f32 to vector<32x256xf32>
    %125 = arith.select %121, %123, %124 : vector<32x256xi1>, vector<32x256xf32>
    %126 = arith.truncf %125 : vector<32x256xf32> to vector<32x256xbf16>
    %c224_i32_48 = arith.constant 224 : i32
    %127 = tpu.dynamic_rotate %77 by %c224_i32_48 dim 1 : vector<32x256xf32>, i32 -> vector<32x256xf32>
    %c224_i32_49 = arith.constant 224 : i32
    %128 = vector.broadcast %c224_i32_49 : i32 to vector<32x256xi32>
    %129 = arith.cmpi slt, %2, %128 : vector<32x256xi32>
    %cst_50 = arith.constant 0.000000e+00 : f32
    %130 = vector.broadcast %cst_50 : f32 to vector<32x256xf32>
    %131 = arith.select %129, %127, %130 : vector<32x256xi1>, vector<32x256xf32>
    %132 = arith.truncf %131 : vector<32x256xf32> to vector<32x256xbf16>
    %c222_i32 = arith.constant 222 : i32
    %133 = tpu.dynamic_rotate %77 by %c222_i32 dim 1 : vector<32x256xf32>, i32 -> vector<32x256xf32>
    %c224_i32_51 = arith.constant 224 : i32
    %134 = vector.broadcast %c224_i32_51 : i32 to vector<32x256xi32>
    %135 = arith.cmpi slt, %2, %134 : vector<32x256xi32>
    %c14_i32_52 = arith.constant 14 : i32
    %136 = vector.broadcast %c14_i32_52 : i32 to vector<32x256xi32>
    %137 = arith.cmpi slt, %4, %136 : vector<32x256xi32>
    %cst_53 = arith.constant 0.000000e+00 : f32
    %138 = vector.broadcast %cst_53 : f32 to vector<32x256xf32>
    %139 = arith.select %135, %133, %138 : vector<32x256xi1>, vector<32x256xf32>
    %cst_54 = arith.constant 0.000000e+00 : f32
    %140 = vector.broadcast %cst_54 : f32 to vector<32x256xf32>
    %141 = arith.select %137, %139, %140 : vector<32x256xi1>, vector<32x256xf32>
    %142 = arith.truncf %141 : vector<32x256xf32> to vector<32x256xbf16>
    %143 = tpu.concatenate %87, %93, %103, %109, %110, %116, %126, %132, %142 in 0 : vector<32x256xbf16>, vector<32x256xbf16>, vector<32x256xbf16>, vector<32x256xbf16>, vector<32x256xbf16>, vector<32x256xbf16>, vector<32x256xbf16>, vector<32x256xbf16>, vector<32x256xbf16> -> vector<288x256xbf16>
    %c0_55 = arith.constant 0 : index
    %c0_56 = arith.constant 0 : index
    %144 = vector.load %arg4[%c0_55, %c0_56] : memref<32x288xbf16, #tpu.memory_space<vmem>>, vector<32x288xbf16>
    %cst_57 = arith.constant dense<0.000000e+00> : vector<32x256xf32>
    %145 = tpu.matmul %144, %143, %cst_57 {dimension_numbers = #tpu.dot_dimension_numbers<[1], [0], [0], [1], [0, 0, 1, 1], [], []>} : vector<32x288xbf16>, vector<288x256xbf16>, vector<32x256xf32> -> vector<32x256xf32>
    %c0_58 = arith.constant 0 : index
    %c0_59 = arith.constant 0 : index
    %146 = vector.load %arg5[%c0_58, %c0_59] : memref<32x1xf32, #tpu.memory_space<vmem>>, vector<32x1xf32>
    %147 = vector.broadcast %146 : vector<32x1xf32> to vector<32x256xf32>
    %148 = arith.addf %145, %147 : vector<32x256xf32>
    %cst_60 = arith.constant dense<0.000000e+00> : vector<32xf32>
    %149 = vector.multi_reduction <add>, %148, %cst_60 [1] : vector<32x256xf32> to vector<32xf32>
    %150 = vector.shape_cast %149 : vector<32xf32> to vector<32x1xf32>
    %cst_61 = arith.constant 2.560000e+02 : f32
    %151 = vector.broadcast %cst_61 : f32 to vector<32x1xf32>
    %152 = arith.divf %150, %151 : vector<32x1xf32>
    %c0_62 = arith.constant 0 : index
    %c0_63 = arith.constant 0 : index
    %153 = vector.load %arg6[%c0_62, %c0_63] : memref<2x32xf32, #tpu.memory_space<vmem>>, vector<2x32xf32>
    %cst_64 = arith.constant dense<0.000000e+00> : vector<2x1xf32>
    %154 = tpu.matmul %153, %152, %cst_64 {dimension_numbers = #tpu.dot_dimension_numbers<[1], [0], [0], [1], [0, 0, 1, 1], [], []>} : vector<2x32xf32>, vector<32x1xf32>, vector<2x1xf32> -> vector<2x1xf32>
    %c0_65 = arith.constant 0 : index
    %c0_66 = arith.constant 0 : index
    %155 = vector.load %arg7[%c0_65, %c0_66] : memref<2x1xf32, #tpu.memory_space<vmem>>, vector<2x1xf32>
    %156 = arith.addf %154, %155 : vector<2x1xf32>
    %cst_67 = arith.constant 0.000000e+00 : f32
    %157 = vector.broadcast %cst_67 : f32 to vector<2x1xf32>
    %158 = arith.maximumf %156, %157 : vector<2x1xf32>
    %c0_68 = arith.constant 0 : index
    %c0_69 = arith.constant 0 : index
    %159 = vector.load %arg8[%c0_68, %c0_69] : memref<32x2xf32, #tpu.memory_space<vmem>>, vector<32x2xf32>
    %cst_70 = arith.constant dense<0.000000e+00> : vector<32x1xf32>
    %160 = tpu.matmul %159, %158, %cst_70 {dimension_numbers = #tpu.dot_dimension_numbers<[1], [0], [0], [1], [0, 0, 1, 1], [], []>} : vector<32x2xf32>, vector<2x1xf32>, vector<32x1xf32> -> vector<32x1xf32>
    %c0_71 = arith.constant 0 : index
    %c0_72 = arith.constant 0 : index
    %161 = vector.load %arg9[%c0_71, %c0_72] : memref<32x1xf32, #tpu.memory_space<vmem>>, vector<32x1xf32>
    %162 = arith.addf %160, %161 : vector<32x1xf32>
    %163 = arith.negf %162 : vector<32x1xf32>
    %164 = math.exp %163 : vector<32x1xf32>
    %cst_73 = arith.constant 1.000000e+00 : f32
    %165 = vector.broadcast %cst_73 : f32 to vector<32x1xf32>
    %166 = arith.addf %165, %164 : vector<32x1xf32>
    %167 = arith.divf %165, %166 : vector<32x1xf32>
    %168 = vector.broadcast %167 : vector<32x1xf32> to vector<32x256xf32>
    %169 = arith.mulf %148, %168 : vector<32x256xf32>
    %170 = arith.addf %169, %1 : vector<32x256xf32>
    %c0_74 = arith.constant 0 : index
    %c0_75 = arith.constant 0 : index
    %c0_76 = arith.constant 0 : index
    %171 = vector.load %arg10[%c0_74, %c0_75, %c0_76] : memref<1x32x256xf32, #tpu.memory_space<vmem>>, vector<1x32x256xf32>
    %172 = vector.shape_cast %171 : vector<1x32x256xf32> to vector<32x256xf32>
    %173 = vector.shape_cast %170 : vector<32x256xf32> to vector<1x32x256xf32>
    tpu.vector_store %arg10[%c0_74, %c0_75, %c0_76], %173 {strides = array<i32>} : memref<1x32x256xf32, #tpu.memory_space<vmem>>, vector<1x32x256xf32>,
    return
  }
  func.func @transform_0(%arg0: i32) -> (i32, i32, i32) {
    %c0_i32 = arith.constant 0 : i32
    %c0_i32_0 = arith.constant 0 : i32
    %c0_i32_1 = arith.constant 0 : i32
    return %arg0, %c0_i32, %c0_i32_0 : i32, i32, i32
  }
  func.func @transform_1(%arg0: i32) -> (i32, i32) {
    %c0_i32 = arith.constant 0 : i32
    %c0_i32_0 = arith.constant 0 : i32
    %c0_i32_1 = arith.constant 0 : i32
    return %c0_i32, %c0_i32_0 : i32, i32
  }
  func.func @transform_2(%arg0: i32) -> (i32, i32) {
    %c0_i32 = arith.constant 0 : i32
    %c0_i32_0 = arith.constant 0 : i32
    %c0_i32_1 = arith.constant 0 : i32
    return %c0_i32, %c0_i32_0 : i32, i32
  }
  func.func @transform_3(%arg0: i32) -> (i32, i32) {
    %c0_i32 = arith.constant 0 : i32
    %c0_i32_0 = arith.constant 0 : i32
    %c0_i32_1 = arith.constant 0 : i32
    return %c0_i32, %c0_i32_0 : i32, i32
  }
  func.func @transform_4(%arg0: i32) -> (i32, i32) {
    %c0_i32 = arith.constant 0 : i32
    %c0_i32_0 = arith.constant 0 : i32
    %c0_i32_1 = arith.constant 0 : i32
    return %c0_i32, %c0_i32_0 : i32, i32
  }
  func.func @transform_5(%arg0: i32) -> (i32, i32) {
    %c0_i32 = arith.constant 0 : i32
    %c0_i32_0 = arith.constant 0 : i32
    %c0_i32_1 = arith.constant 0 : i32
    return %c0_i32, %c0_i32_0 : i32, i32
  }
  func.func @transform_6(%arg0: i32) -> (i32, i32) {
    %c0_i32 = arith.constant 0 : i32
    %c0_i32_0 = arith.constant 0 : i32
    %c0_i32_1 = arith.constant 0 : i32
    return %c0_i32, %c0_i32_0 : i32, i32
  }
  func.func @transform_7(%arg0: i32) -> (i32, i32) {
    %c0_i32 = arith.constant 0 : i32
    %c0_i32_0 = arith.constant 0 : i32
    %c0_i32_1 = arith.constant 0 : i32
    return %c0_i32, %c0_i32_0 : i32, i32
  }
  func.func @transform_8(%arg0: i32) -> (i32, i32) {
    %c0_i32 = arith.constant 0 : i32
    %c0_i32_0 = arith.constant 0 : i32
    %c0_i32_1 = arith.constant 0 : i32
    return %c0_i32, %c0_i32_0 : i32, i32
  }
  func.func @transform_9(%arg0: i32) -> (i32, i32, i32) {
    %c0_i32 = arith.constant 0 : i32
    %c0_i32_0 = arith.constant 0 : i32
    %c0_i32_1 = arith.constant 0 : i32
    return %arg0, %c0_i32, %c0_i32_0 : i32, i32, i32
  }
}

</mosaic_0001>

<bundles_post_ra>
// kernel: tpu_custom_call.1
= control target key start
LH: loop header
LB: loop body
LE: loop exit
PB: predicated region body
PF: predicated region fallthrough
CT: control target
= control target key end

     0   :  { %14 = vsyncpa [#allocation3], 0  ;;  %s3517_s0 = inlined_call_operand.vmem [shape: f32[2,32,256], index: 0, kind: input, shape index: {}]   ;;  %s3518_s1 = inlined_call_operand.hbm [shape: bf16[32,288], index: 1, kind: input, shape index: {}]   ;;  %s3519_s2 = inlined_call_operand.vmem [shape: f32[32,1], index: 2, kind: input, shape index: {}]   ;;  %s3520_s3 = inlined_call_operand.hbm [shape: bf16[32,288], index: 3, kind: input, shape index: {}]   ;;  %s3521_s4 = inlined_call_operand.vmem [shape: f32[32,1], index: 4, kind: input, shape index: {}]   ;;  %s3522_s5 = inlined_call_operand.vmem [shape: f32[2,32], index: 5, kind: input, shape index: {}]   ;;  %s3523_s6 = inlined_call_operand.vmem [shape: f32[2,1], index: 6, kind: input, shape index: {}]   ;;  %s3524_s7 = inlined_call_operand.vmem [shape: f32[32,2], index: 7, kind: input, shape index: {}]   ;;  %s3525_s8 = inlined_call_operand.vmem [shape: f32[32,1], index: 8, kind: input, shape index: {}]   ;;  %s3526_s9 = inlined_call_operand.hbm [shape: f32[2,32,256], index: 9, kind: output, shape index: {}]  }
   0x1   :  { %15 = vsyncpa [#allocation6], 0 }
   0x2   :  { %16 = vsyncpa [#allocation4], 0 }
   0x3   :  { %18 = vsyncpa [#allocation4 + $0x1], 0  ;;  %s2663_s30 = smov 0   ;;  %s2665_s10 = smov 0  }
   0x4   :  { %s2667_s11 = smov 0   ;;  %s2669_s12 = smov 0  }
   0x5 LB: > { %s2684_s13 = sadd.s32 4294967295, %s2586_s12   ;;  %s1781_s14 = sadd.s32 4294967294, %s2586_s12   ;;  %s2586_s12 = sphi %s2669_s12, %s3564_s12   ;;  %s2582_s11 = sphi %s2667_s11, %s3563_s11   ;;  %s2578_s10 = sphi %s2665_s10, %s3562_s10   ;;  %s2574_s30 = sphi %s2663_s30, %s3561_s30  }
   0x6   : > { %s2688_s15 = sadd.s32 1, %s2586_s12   ;;  %s225_s16 = sadd.s32 1, %s2582_s11 }
   0x7   : > { %s222_s17 = ssub.s32 %s2586_s12, %s2688_s15  ;;  %p235_p0 = scmp.ne.s32.totalorder %s2582_s11, %s2578_s10 }
   0x8   : > { %p223_p1 = scmp.eq.s32.totalorder %s222_s17, 0  ;;  %p236_p2 = scmp.eq.s32.totalorder %s2684_s13, 1 }
   0x9   : > { %p241_p3 = scmp.ne.s32.totalorder %s2578_s10, %s2574_s30  ;;  %p242_p4 = scmp.eq.s32.totalorder %s1781_s14, 1 }
   0xa   : > { %s2699_s18 = scalar_select %p223_p1, %s2582_s11, %s225_s16  }
   0xb   : > { %p2701_p5 = por %p236_p2, %p235_p0  ;;  %p2705_p6 = por %p242_p4, %p241_p3 }
   0xc   : > { %p1782_p7 = scmp.ge.s32.totalorder %s2586_s12, 1  ;;  %p249_p8 = scmp.lt.s32.totalorder %s2586_s12, 3 }
   0xd   : > { %s3529_s20 = scalar_select %p2705_p6, 1, 0 }
   0xe   : > { %p3527_p9 = scmp.eq.s32.totalorder %s2684_s13, 0  ;;  %p2712_p10 = pnand %p1782_p7, %p249_p8 }
   0xf   : > { %s2588_s22 = smov [#allocation2]   ;;  %s2589_s25 = smov [#allocation5]  }
  0x10   : > { %s261_s23 = sshll.u32 %s2588_s22, 4  ;;  %p2032_p11 = pneg %p2712_p10  ;;  %s262_s23 = int_to_ptr.vmem [resolvable:$true] %s261_s23 }
  0x11   : > { %s277_s26 = sshll.u32 %s2589_s25, 4  ;;  %s2477_s27 = scalar_lea.vmem %s262_s23, 768  ;;  %s278_s26 = int_to_ptr.vmem [resolvable:$true] %s277_s26 }
  0x12   : > { %p2720_p12 = pnand %p3527_p9, %p2032_p11  ;;  %p2478_p0 = scmp.ne.s32.totalorder %s262_s23, %s2477_s27 }
  0x13   : > { %p2485_p3 = scmp.lt.s32.totalorder %s262_s23, %s262_s23  ;;  %p2486_p4 = scmp.lt.s32.totalorder %s2477_s27, %s2477_s27 }
  0x14   : > { %p2468_p13 = pneg %p2720_p12 }
  0x15   : > { %p2487_p7 = por %p2486_p4, %p2485_p3 }
  0x16   : > { %p2480_p1 = pnand %p2478_p0, %p2468_p13 }
  0x18   : > { %p2481_p2 = pneg %p2480_p1 }
  0x1a   : > { %p2488_p8 = pnand %p2487_p7, %p2481_p2 }
  0x1c   : > { %2491 = shalt.err (!%p2488_p8)
}
  0x1d   : > { %s2590_s28 = smov 192   ;;  %s2591_s29 = smov 12  }
  0x1e   : > { %2035 = dma.hbm_to_vmem [thread:$0]  (!%p2720_p12), %s3518_s1, 768, %s262_s23, [#allocation3], %s2590_s28, %s2590_s28, %s2591_s29  }
  0x1f   : > { %s2503_s17 = scalar_lea.vmem %s278_s26, 768  ;;  %p2511_p9 = scmp.lt.s32.totalorder %s278_s26, %s278_s26 }
  0x20   : > { %p2504_p11 = scmp.ne.s32.totalorder %s278_s26, %s2503_s17  ;;  %p2512_p6 = scmp.lt.s32.totalorder %s2503_s17, %s2503_s17 }
  0x22   : > { %p2506_p0 = pnand %p2504_p11, %p2468_p13  ;;  %p2513_p3 = por %p2512_p6, %p2511_p9 }
  0x24   : > { %p2507_p1 = pneg %p2506_p0 }
  0x26   : > { %p2514_p2 = pnand %p2513_p3, %p2507_p1 }
  0x28   : > { %2517 = shalt.err (!%p2514_p2)
}
  0x29   : > { %2038 = dma.hbm_to_vmem [thread:$0]  (!%p2720_p12), %s3520_s3, 768, %s278_s26, [#allocation6], %s2590_s28, %s2590_s28, %s2591_s29  }
  0x2a   : > { %316 = sbr.rel (%p2712_p10) target bundleno = 1585 (0x631), region = 56  ;;  %p3532_p4 = scmp.eq.s32.totalorder (!%p2712_p10), %s2684_s13, 0 }
  0x2f   : > { %2561 = dma.done.wait (%p3532_p4), [#allocation3], 768   ;;  %p3533_p13 = pmov %p3532_p4 }
  0x30   : > { %p3534_p7 = pmov %p3532_p4 }
  0x31   : > { %2563 = vsyncadd (%p3533_p13), [#allocation3], 4294966528 }
  0x32   : > { %2565 = dma.done.wait (%p3534_p7), [#allocation6], 768   ;;  %p3535_p6 = pmov %p3532_p4 }
  0x33   : > { %p356_p9 = scmp.lt.s32.totalorder %s2684_s13, 1  ;;  %s2592_s28 = smov 1   ;;  %v2600_v12 = vmov 0   ;;  %v2429_v13 = vld [vmem:[#allocation2 + $0x4] ss:$12 sps:$4 sm:$0xff]   ;;  %v726_v14 = vld [vmem:[%s3519_s2 + $0x18] sm:$0xff]  ;;  %v370_v18 = vlaneseq }
  0x34   : > { %2567 = vsyncadd (%p3535_p6), [#allocation6], 4294966528  ;;  %s2593_s29 = smov 15   ;;  %s2594_s14 = smov 16   ;;  %869 = vmatprep.mubr.bf16.mxu1 %v2600_v12  ;;  %2265 = vset.pattern.permute.xlu1 %v2600_v12  ;;  %v725_v15 = vld [vmem:[%s3519_s2 + $0x10] sm:$0xff]  ;;  %v723_v16 = vld [vmem:[%s3519_s2] sm:$0xff] }
  0x35   : > { %s357_s23 = scalar_select %p356_p9, %s2684_s13, 1  ;;  %2264 = vset.pattern.permute.xlu0 %v2600_v12  ;;  %816 = vmatprep.mubr.bf16.mxu0 %v2429_v13  ;;  %v724_v17 = vld [vmem:[%s3519_s2 + $0x8] sm:$0xff]  ;;  %v2810_v19 = vand.u32 127, %v370_v18 }
  0x36   : > { %s2595_s16 = smov 17   ;;  %s2596_s17 = smov 112  }
  0x37   : > { %s1991_s24 = sshll.u32 %s357_s23, 6  ;;  %s2597_s22 = smov 113   ;;  %v2813_v20 = vadd.s32 128, %v2810_v19  ;;  %v2819_v24 = vand.u32 15, %v2810_v19  ;;  %vm524_vm0 = vcmp.lt.s32.totalorder %v2810_v19, 1  ;;  %vm400_vm3 = vcmp.ge.s32.totalorder %v2810_v19, 16 }
  0x38   : > { %s2757_s27 = scalar_lea.vmem %s3517_s0, %s1991_s24  ;;  %s2598_s25 = smov 127   ;;  %vm477_vm4 = vcmp.lt.s32.totalorder %v2810_v19, 15  ;;  %vm440_vm8 = vcmp.lt.s32.totalorder %v2810_v19, 16  ;;  %vm391_vm12 = vcmp.lt.s32.totalorder %v2810_v19, 17  ;;  %vm2926_vm13 = vmpackc.low %vm400_vm3, %vm400_vm3  ;;  %vm649_vm14 = vcmp.lt.s32.totalorder %v2810_v19, 112 }
  0x39   : > { %v2760_v0 = vld [vmem:[%s2757_s27 + $0x20] sm:$0xff]  ;;  %v2763_v1 = vld [vmem:[%s2757_s27 + $0x30] sm:$0xff]  ;;  %v2774_v5 = vld [vmem:[%s2757_s27 + $0x28] sm:$0xff]  ;;  %s2599_s23 = smov 111   ;;  %v2816_v23 = vand.u32 15, %v2813_v20  ;;  %vm402_vm2 = vcmp.ge.s32.totalorder %v2819_v24, 1 }
  0x3a   : > { %v2766_v2 = vld [vmem:[%s2757_s27] sm:$0xff]  ;;  %v2104_v3 = vpack.i.bf16 %v2763_v1, %v2760_v0  ;;  %v2771_v4 = vld [vmem:[%s2757_s27 + $0x10] sm:$0xff]  ;;  %v2777_v6 = vld [vmem:[%s2757_s27 + $0x38] sm:$0xff]  ;;  %vm486_vm10 = vcmp.lt.s32.totalorder %v2819_v24, 15  ;;  %vm612_vm15 = vcmp.lt.s32.totalorder %v2813_v20, 240  ;;  %s2603_s24 = smov 32  }
  0x3b   : > { %v2114_v7 = vpack.i.bf16 %v2771_v4, %v2766_v2  ;;  %v2782_v8 = vld [vmem:[%s2757_s27 + $0x8] sm:$0xff]  ;;  %v2785_v9 = vld [vmem:[%s2757_s27 + $0x18] sm:$0xff]  ;;  %v2109_v10 = vpack.i.bf16 %v2777_v6, %v2774_v5  ;;  %vm403_vm1 = vcmp.ge.s32.totalorder %v2816_v23, 1  ;;  %vm2845_vm6 = vmpackc.low %vm402_vm2, %vm402_vm2  ;;  %vm487_vm7 = vcmp.lt.s32.totalorder %v2816_v23, 15  ;;  %s2604_s26 = smov 34   ;;  %s2605_s21 = smov 96  }
  0x3c   : > { %2105 = vrot.lane.b32.xlu0 %v2104_v3, %s2592_s28  ;;  %v2119_v11 = vpack.i.bf16 %v2785_v9, %v2782_v8  ;;  %vm2838_vm5 = vmpackc.low %vm403_vm1, %vm403_vm1  ;;  %vm602_vm1 = vcmp.lt.s32.totalorder %v2810_v19, 113  ;;  %vm565_vm2 = vcmp.lt.s32.totalorder %v2810_v19, 127 }
  0x3d   : > { %2115 = vrot.lane.b32.xlu1 %v2114_v7, %s2592_s28  ;;  %vm2876_vm9 = vmpackc.low %vm487_vm7, %vm487_vm7  ;;  %vm925_vm7 = vcmp.ge.s32.totalorder %v2819_v24, 2 }
  0x3e   : > { %vm2900_vm11 = vmpackc.low %vm486_vm10, %vm486_vm10  ;;  %vm923_vm10 = vcmp.ge.s32.totalorder %v2810_v19, 32 }
  0x40   : > { %2110 = vrot.lane.b32.xlu0 %v2109_v10, %s2592_s28 }
  0x41   : > { %2120 = vrot.lane.b32.xlu1 %v2119_v11, %s2592_s28  ;;  %s2606_s28 = smov 98  }
  0x44   : > { %2125 = vrot.lane.b32.xlu0 %v2104_v3, %s2593_s29 }
  0x45   : > { %2130 = vrot.lane.b32.xlu1 %v2109_v10, %s2593_s29 }
  0x48   : > { %2135 = vrot.lane.b32.xlu0 %v2114_v7, %s2593_s29 }
  0x49   : > { %2140 = vrot.lane.b32.xlu1 %v2119_v11, %s2593_s29  ;;  %s2607_s29 = smov 126  }
  0x4c   : > { %2145 = vrot.lane.b32.xlu0 %v2104_v3, %s2594_s14 }
  0x4d   : > { %2150 = vrot.lane.b32.xlu1 %v2109_v10, %s2594_s14 }
  0x50   : > { %2155 = vrot.lane.b32.xlu0 %v2114_v7, %s2594_s14 }
  0x51   : > { %2160 = vrot.lane.b32.xlu1 %v2119_v11, %s2594_s14 }
  0x54   : > { %2165 = vrot.lane.b32.xlu0 %v2104_v3, %s2595_s16 }
  0x55   : > { %2170 = vrot.lane.b32.xlu1 %v2109_v10, %s2595_s16 }
  0x58   : > { %2175 = vrot.lane.b32.xlu0 %v2114_v7, %s2595_s16 }
  0x59   : > { %2180 = vrot.lane.b32.xlu1 %v2119_v11, %s2595_s16  ;;  %s2608_s16 = smov 94  }
  0x5c   : > { %2185 = vrot.lane.b32.xlu0 %v2104_v3, %s2596_s17 }
  0x5d   : > { %2190 = vrot.lane.b32.xlu1 %v2109_v10, %s2596_s17 }
  0x60   : > { %2195 = vrot.lane.b32.xlu0 %v2114_v7, %s2596_s17 }
  0x61   : > { %2200 = vrot.lane.b32.xlu1 %v2119_v11, %s2596_s17 }
  0x64   : > { %2205 = vrot.lane.b32.xlu0 %v2104_v3, %s2597_s22 }
  0x65   : > { %2210 = vrot.lane.b32.xlu1 %v2109_v10, %s2597_s22 }
  0x68   : > { %2215 = vrot.lane.b32.xlu0 %v2114_v7, %s2597_s22 }
  0x69   : > { %2220 = vrot.lane.b32.xlu1 %v2119_v11, %s2597_s22  ;;  %s1992_s22 = sshll.u32 %s2684_s13, 10 }
  0x6c   : > { %2225 = vrot.lane.b32.xlu0 %v2104_v3, %s2598_s25 }
  0x6d   : > { %2230 = vrot.lane.b32.xlu1 %v2109_v10, %s2598_s25 }
  0x70   : > { %2235 = vrot.lane.b32.xlu0 %v2114_v7, %s2598_s25 }
  0x71   : > { %2240 = vrot.lane.b32.xlu1 %v2119_v11, %s2598_s25  ;;  %s2601_s25 = smov 2  }
  0x74   : > { %2245 = vrot.lane.b32.xlu0 %v2104_v3, %s2599_s23 }
  0x75   : > { %2250 = vrot.lane.b32.xlu1 %v2109_v10, %s2599_s23 }
  0x78   : > { %2255 = vrot.lane.b32.xlu0 %v2114_v7, %s2599_s23 }
  0x79   : > { %2260 = vrot.lane.b32.xlu1 %v2119_v11, %s2599_s23  ;;  %s2602_s23 = smov 30  }
  0x7c   : > { %739 = vperm.xlu0 %2264, %v725_v15  }
  0x7d   : > { %744 = vperm.xlu1 %2265, %v726_v14  }
  0x80   : > { %734 = vperm.xlu0 %2264, %v724_v17  }
  0x81   : > { %729 = vperm.xlu1 %2265, %v723_v16  }
  0xae   : > { %v2106_v21 = vpop.permute.xlu0 %2105 }
  0xaf   : > { %v2116_v22 = vpop.permute.xlu1 %2115  ;;  %v2108_v28 = vunpack.i.h.bf16 %v2106_v21  ;;  %v2107_v29 = vunpack.i.l.bf16 %v2106_v21 }
  0xb0   : > { %v2118_v25 = vunpack.i.h.bf16 %v2116_v22  ;;  %v2117_v26 = vunpack.i.l.bf16 %v2116_v22 }
  0xb2   : > { %v2111_v27 = vpop.permute.xlu0 %2110 }
  0xb3   : > { %v2113_v30 = vunpack.i.h.bf16 %v2111_v27  ;;  %v2112_v31 = vunpack.i.l.bf16 %v2111_v27  ;;  %v2121_v32 = vpop.permute.xlu1 %2120 }
  0xb4   : > { %v2123_v33 = vunpack.i.h.bf16 %v2121_v32  ;;  %v2122_v34 = vunpack.i.l.bf16 %v2121_v32 }
  0xb5   : > { %v527_v35 = vsel %vm524_vm0, %v2107_v29, %v2112_v31  ;;  %v528_v36 = vsel %vm524_vm0, %v2108_v28, %v2113_v30  ;;  %v531_v37 = vsel %vm524_vm0, %v2112_v31, %v2107_v29  ;;  %v532_v38 = vsel %vm524_vm0, %v2113_v30, %v2108_v28 }
  0xb6   : > { %v525_v39 = vsel %vm524_vm0, %v2117_v26, %v2122_v34  ;;  %v526_v40 = vsel %vm524_vm0, %v2118_v25, %v2123_v33  ;;  %v2126_v41 = vpop.permute.xlu0 %2125  ;;  %v1799_v48 = vpack.c.bf16 %v528_v36, %v527_v35  ;;  %v1802_v50 = vpack.c.bf16 %v532_v38, %v531_v37 }
  0xb7   : > { %v2128_v42 = vunpack.i.h.bf16 %v2126_v41  ;;  %v2127_v43 = vunpack.i.l.bf16 %v2126_v41  ;;  %v2131_v44 = vpop.permute.xlu1 %2130  ;;  %v529_v51 = vsel %vm524_vm0, %v2122_v34, %v2117_v26  ;;  %v530_v52 = vsel %vm524_vm0, %v2123_v33, %v2118_v25  ;;  %vm2977_vm0 = vmpackc.low %vm612_vm15, %vm612_vm15 }
  0xb8   : > { %v2133_v46 = vunpack.i.h.bf16 %v2131_v44  ;;  %v2132_v47 = vunpack.i.l.bf16 %v2131_v44  ;;  %v1805_v53 = vpack.c.bf16 %v526_v40, %v525_v39  ;;  %1800 = vmatprep.subr.msk.bf16.mxu0 %vm2838_vm5, %v1799_v48  ;;  %v1808_v11 = vpack.c.bf16 %v530_v52, %v529_v51 }
  0xb9   : > { %1803 = vmatpush1.bf16.msk.msra.mxu0 %vm2845_vm6, %v1802_v50 }
  0xba   : > { %v481_v54 = vsel %vm477_vm4, %v2128_v42, %v2133_v46  ;;  %v485_v55 = vsel %vm477_vm4, %v2133_v46, %v2128_v42  ;;  %v480_v56 = vsel %vm477_vm4, %v2127_v43, %v2132_v47  ;;  %v484_v57 = vsel %vm477_vm4, %v2132_v47, %v2127_v43  ;;  %v2136_v58 = vpop.permute.xlu0 %2135  ;;  %1806 = vmatprep.subr.msk.bf16.mxu0 %vm2838_vm5, %v1805_v53 }
  0xbb   : > { %v494_v59 = vsel %vm400_vm3, %v485_v55, 0.0  ;;  %v492_v60 = vsel %vm400_vm3, %v484_v57, 0.0  ;;  %v2138_v61 = vunpack.i.h.bf16 %v2136_v58  ;;  %v2141_v62 = vpop.permute.xlu1 %2140  ;;  %v1811_v63 = vpack.c.bf16 %v481_v54, %v480_v56 }
  0xbc   : > { %v2137_v3 = vunpack.i.l.bf16 %v2136_v58  ;;  %v2143_v7 = vunpack.i.h.bf16 %v2141_v62  ;;  %v2142_v10 = vunpack.i.l.bf16 %v2141_v62  ;;  %v1814_v27 = vpack.c.bf16 %v494_v59, %v492_v60 }
  0xbd   : > { %1809 = vmatpush1.bf16.msk.msra.mxu0 %vm2845_vm6, %v1808_v11 }
  0xbe   : > { %v479_v14 = vsel %vm477_vm4, %v2138_v61, %v2143_v7  ;;  %v483_v15 = vsel %vm477_vm4, %v2143_v7, %v2138_v61  ;;  %v478_v16 = vsel %vm477_vm4, %v2137_v3, %v2142_v10  ;;  %v482_v17 = vsel %vm477_vm4, %v2142_v10, %v2137_v3  ;;  %v2146_v18 = vpop.permute.xlu0 %2145  ;;  %1812 = vmatprep.subr.msk.bf16.mxu0 %vm2876_vm9, %v1811_v63 }
  0xbf   : > { %v490_v21 = vsel %vm400_vm3, %v483_v15, 0.0  ;;  %v488_v22 = vsel %vm400_vm3, %v482_v17, 0.0  ;;  %v2148_v25 = vunpack.i.h.bf16 %v2146_v18  ;;  %v2151_v26 = vpop.permute.xlu1 %2150  ;;  %v1817_v28 = vpack.c.bf16 %v479_v14, %v478_v16 }
  0xc0   : > { %v2147_v29 = vunpack.i.l.bf16 %v2146_v18  ;;  %v2153_v30 = vunpack.i.h.bf16 %v2151_v26  ;;  %v2152_v31 = vunpack.i.l.bf16 %v2151_v26  ;;  %v1820_v39 = vpack.c.bf16 %v490_v21, %v488_v22 }
  0xc1   : > { %1815 = vmatpush1.bf16.msk.msra.mxu0 %vm2900_vm11, %v1814_v27  ;;  %vm777_vm4 = vcmask 261120  }
  0xc2   : > { %v2156_v33 = vpop.permute.xlu0 %2155  ;;  %v443_v34 = vsel %vm440_vm8, %v2147_v29, %v2152_v31  ;;  %v444_v35 = vsel %vm440_vm8, %v2148_v25, %v2153_v30  ;;  %1818 = vmatprep.subr.msk.bf16.mxu0 %vm2876_vm9, %v1817_v28  ;;  %v448_v43 = vsel %vm440_vm8, %v2153_v30, %v2148_v25  ;;  %v447_v44 = vsel %vm440_vm8, %v2152_v31, %v2147_v29 }
  0xc3   : > { %v2158_v36 = vunpack.i.h.bf16 %v2156_v33  ;;  %v2157_v37 = vunpack.i.l.bf16 %v2156_v33  ;;  %v2161_v38 = vpop.permute.xlu1 %2160  ;;  %v460_v42 = vpack.c.bf16 %v444_v35, %v443_v34  ;;  %v1823_v57 = vpack.c.bf16 %v448_v43, %v447_v44 }
  0xc4   : > { %v2163_v40 = vunpack.i.h.bf16 %v2161_v38  ;;  %v2162_v41 = vunpack.i.l.bf16 %v2161_v38 }
  0xc5   : > { %1821 = vmatpush1.bf16.msk.msra.mxu0 %vm2900_vm11, %v1820_v39 }
  0xc6   : > { %v2166_v46 = vpop.permute.xlu0 %2165  ;;  %v441_v47 = vsel %vm440_vm8, %v2157_v37, %v2162_v41  ;;  %v442_v48 = vsel %vm440_vm8, %v2158_v36, %v2163_v40  ;;  %792 = vmatprep.subr.bf16.mxu0 %v460_v42  ;;  %v446_v58 = vsel %vm440_vm8, %v2163_v40, %v2158_v36  ;;  %v445_v59 = vsel %vm440_vm8, %v2162_v41, %v2157_v37 }
  0xc7   : > { %v2168_v50 = vunpack.i.h.bf16 %v2166_v46  ;;  %v2167_v51 = vunpack.i.l.bf16 %v2166_v46  ;;  %v2171_v52 = vpop.permute.xlu1 %2170  ;;  %v458_v56 = vpack.c.bf16 %v442_v48, %v441_v47  ;;  %v1826_v21 = vpack.c.bf16 %v446_v58, %v445_v59 }
  0xc8   : > { %v2173_v53 = vunpack.i.h.bf16 %v2171_v52  ;;  %v2172_v54 = vunpack.i.l.bf16 %v2171_v52 }
  0xc9   : > { %1824 = vmatpush1.bf16.msk.msra.mxu0 %vm2926_vm13, %v1823_v57 }
  0xca   : > { %v395_v60 = vsel %vm391_vm12, %v2168_v50, %v2173_v53  ;;  %v399_v61 = vsel %vm391_vm12, %v2173_v53, %v2168_v50  ;;  %v394_v62 = vsel %vm391_vm12, %v2167_v51, %v2172_v54  ;;  %v398_v63 = vsel %vm391_vm12, %v2172_v54, %v2167_v51  ;;  %v2176_v3 = vpop.permute.xlu0 %2175  ;;  %794 = vmatprep.subr.bf16.mxu0 %v458_v56 }
  0xcb   : > { %v410_v7 = vsel %vm400_vm3, %v399_v61, 0.0  ;;  %v408_v10 = vsel %vm400_vm3, %v398_v63, 0.0  ;;  %v2178_v11 = vunpack.i.h.bf16 %v2176_v3  ;;  %v2181_v14 = vpop.permute.xlu1 %2180  ;;  %v1829_v15 = vpack.c.bf16 %v395_v60, %v394_v62 }
  0xcc   : > { %v2177_v16 = vunpack.i.l.bf16 %v2176_v3  ;;  %v2183_v17 = vunpack.i.h.bf16 %v2181_v14  ;;  %v2182_v18 = vunpack.i.l.bf16 %v2181_v14  ;;  %v1832_v34 = vpack.c.bf16 %v410_v7, %v408_v10 }
  0xcd   : > { %1827 = vmatpush1.bf16.msk.msra.mxu0 %vm2926_vm13, %v1826_v21  ;;  %vm1009_vm13 = vcmp.lt.s32.totalorder %v2819_v24, 14 }
  0xce   : > { %v393_v22 = vsel %vm391_vm12, %v2178_v11, %v2183_v17  ;;  %v397_v25 = vsel %vm391_vm12, %v2183_v17, %v2178_v11  ;;  %v392_v26 = vsel %vm391_vm12, %v2177_v16, %v2182_v18  ;;  %v396_v27 = vsel %vm391_vm12, %v2182_v18, %v2177_v16  ;;  %v2186_v28 = vpop.permute.xlu0 %2185  ;;  %1830 = vmatprep.subr.msk.bf16.mxu0 %vm2838_vm5, %v1829_v15 }
  0xcf   : > { %v406_v29 = vsel %vm400_vm3, %v397_v25, 0.0  ;;  %v404_v30 = vsel %vm400_vm3, %v396_v27, 0.0  ;;  %v2188_v31 = vunpack.i.h.bf16 %v2186_v28  ;;  %v2191_v33 = vpop.permute.xlu1 %2190  ;;  %v1835_v35 = vpack.c.bf16 %v393_v22, %v392_v26 }
  0xd0   : > { %v2187_v36 = vunpack.i.l.bf16 %v2186_v28  ;;  %v2193_v37 = vunpack.i.h.bf16 %v2191_v33  ;;  %v2192_v38 = vunpack.i.l.bf16 %v2191_v33  ;;  %v1838_v46 = vpack.c.bf16 %v406_v29, %v404_v30 }
  0xd1   : > { %1833 = vmatpush1.bf16.msk.msra.mxu0 %vm2845_vm6, %v1832_v34  ;;  %vm686_vm3 = vcmp.lt.s32.totalorder %v2810_v19, 111  ;;  %vm1010_vm12 = vcmp.lt.s32.totalorder %v2816_v23, 14 }
  0xd2   : > { %v657_v39 = vsel %vm649_vm14, %v2193_v37, %v2188_v31  ;;  %v656_v40 = vsel %vm649_vm14, %v2192_v38, %v2187_v36  ;;  %v2196_v41 = vpop.permute.xlu0 %2195  ;;  %1836 = vmatprep.subr.msk.bf16.mxu0 %vm2838_vm5, %v1835_v35  ;;  %v652_v55 = vsel %vm649_vm14, %v2187_v36, %v2192_v38  ;;  %v653_v56 = vsel %vm649_vm14, %v2188_v31, %v2193_v37 }
  0xd3   : > { %v2198_v42 = vunpack.i.h.bf16 %v2196_v41  ;;  %v2197_v43 = vunpack.i.l.bf16 %v2196_v41  ;;  %v2201_v44 = vpop.permute.xlu1 %2200  ;;  %v1841_v47 = vpack.c.bf16 %v657_v39, %v656_v40  ;;  %v668_v63 = vpack.c.bf16 %v653_v56, %v652_v55 }
  0xd4   : > { %v2203_v48 = vunpack.i.h.bf16 %v2201_v44  ;;  %v2202_v50 = vunpack.i.l.bf16 %v2201_v44 }
  0xd5   : > { %1839 = vmatpush1.bf16.msk.msra.mxu0 %vm2845_vm6, %v1838_v46 }
  0xd6   : > { %v655_v52 = vsel %vm649_vm14, %v2203_v48, %v2198_v42  ;;  %v654_v53 = vsel %vm649_vm14, %v2202_v50, %v2197_v43  ;;  %v2206_v54 = vpop.permute.xlu0 %2205  ;;  %1842 = vmatprep.subr.msk.bf16.mxu0 %vm2977_vm0, %v1841_v47  ;;  %v650_v11 = vsel %vm649_vm14, %v2197_v43, %v2202_v50  ;;  %v651_v14 = vsel %vm649_vm14, %v2198_v42, %v2203_v48  ;;  %vm3169_vm14 = vmpackc.low %vm1010_vm12, %vm1010_vm12 }
  0xd7   : > { %v2208_v57 = vunpack.i.h.bf16 %v2206_v54  ;;  %v2207_v58 = vunpack.i.l.bf16 %v2206_v54  ;;  %v2211_v59 = vpop.permute.xlu1 %2210  ;;  %v1844_v60 = vpack.c.bf16 %v655_v52, %v654_v53  ;;  %v666_v27 = vpack.c.bf16 %v651_v14, %v650_v11 }
  0xd8   : > { %v2213_v61 = vunpack.i.h.bf16 %v2211_v59  ;;  %v2212_v62 = vunpack.i.l.bf16 %v2211_v59  ;;  %vm1526_vm12 = vcmask 1041408  }
  0xd9   : > { %801 = vmatpush2.bf16.msra.mxu0 %v668_v63 }
  0xda   : > { %v610_v3 = vsel %vm602_vm1, %v2213_v61, %v2208_v57  ;;  %v609_v7 = vsel %vm602_vm1, %v2212_v62, %v2207_v58  ;;  %v2216_v10 = vpop.permute.xlu0 %2215  ;;  %1845 = vmatprep.subr.msk.bf16.mxu0 %vm2977_vm0, %v1844_v60  ;;  %v606_v28 = vsel %vm602_vm1, %v2208_v57, %v2213_v61  ;;  %v605_v29 = vsel %vm602_vm1, %v2207_v58, %v2212_v62 }
  0xdb   : > { %v620_v15 = vsel %vm612_vm15, %v610_v3, 0.0  ;;  %v618_v16 = vsel %vm612_vm15, %v609_v7, 0.0  ;;  %v2218_v17 = vunpack.i.h.bf16 %v2216_v10  ;;  %v2221_v18 = vpop.permute.xlu1 %2220  ;;  %v2217_v21 = vunpack.i.l.bf16 %v2216_v10 }
  0xdc   : > { %v2223_v22 = vunpack.i.h.bf16 %v2221_v18  ;;  %v2222_v25 = vunpack.i.l.bf16 %v2221_v18  ;;  %v1847_v26 = vpack.c.bf16 %v620_v15, %v618_v16  ;;  %v1850_v42 = vpack.c.bf16 %v606_v28, %v605_v29 }
  0xdd   : > { %803 = vmatpush2.bf16.msra.mxu0 %v666_v27  ;;  %vm963_vm0 = vcmp.lt.s32.totalorder %v2810_v19, 32 }
  0xde   : > { %v608_v30 = vsel %vm602_vm1, %v2223_v22, %v2218_v17  ;;  %v607_v31 = vsel %vm602_vm1, %v2222_v25, %v2217_v21  ;;  %v2226_v33 = vpop.permute.xlu0 %2225  ;;  %1848 = vmatprep.subr.msk.bf16.mxu0 %vm2838_vm5, %v1847_v26  ;;  %v604_v43 = vsel %vm602_vm1, %v2218_v17, %v2223_v22  ;;  %v603_v44 = vsel %vm602_vm1, %v2217_v21, %v2222_v25  ;;  %vm3216_vm1 = vmpackc.low %vm923_vm10, %vm923_vm10 }
  0xdf   : > { %v616_v34 = vsel %vm612_vm15, %v608_v30, 0.0  ;;  %v614_v35 = vsel %vm612_vm15, %v607_v31, 0.0  ;;  %v2228_v36 = vunpack.i.h.bf16 %v2226_v33  ;;  %v2231_v37 = vpop.permute.xlu1 %2230  ;;  %v2227_v38 = vunpack.i.l.bf16 %v2226_v33 }
  0xe0   : > { %v2233_v39 = vunpack.i.h.bf16 %v2231_v37  ;;  %v2232_v40 = vunpack.i.l.bf16 %v2231_v37  ;;  %v1853_v41 = vpack.c.bf16 %v616_v34, %v614_v35  ;;  %v1856_v58 = vpack.c.bf16 %v604_v43, %v603_v44  ;;  %v2426_v44 = vld [vmem:[#allocation2 + $0x8] ss:$12 sps:$4 sm:$0xff]  }
  0xe1   : > { %1851 = vmatpush2.bf16.msk.msra.mxu0 %vm2845_vm6, %v1850_v42  ;;  %v548_v17 = vpack.c.bf16 %v2777_v6, %v2774_v5  ;;  %v546_v43 = vpack.c.bf16 %v2785_v9, %v2782_v8  ;;  %v2430_v8 = vld [vmem:[#allocation2 + $0x20] ss:$12 sps:$4 sm:$0xff]   ;;  %v2433_v9 = vld [vmem:[#allocation2 + $0x18] ss:$12 sps:$4 sm:$0xff]  }
  0xe2   : > { %v573_v46 = vsel %vm565_vm2, %v2233_v39, %v2228_v36  ;;  %v572_v47 = vsel %vm565_vm2, %v2232_v40, %v2227_v38  ;;  %v2236_v48 = vpop.permute.xlu0 %2235  ;;  %v569_v50 = vsel %vm565_vm2, %v2228_v36, %v2233_v39  ;;  %v568_v54 = vsel %vm565_vm2, %v2227_v38, %v2232_v40  ;;  %1854 = vmatprep.subr.msk.bf16.mxu0 %vm2838_vm5, %v1853_v41 }
  0xe3   : > { %v2238_v51 = vunpack.i.h.bf16 %v2236_v48  ;;  %v2237_v52 = vunpack.i.l.bf16 %v2236_v48  ;;  %v2241_v53 = vpop.permute.xlu1 %2240  ;;  %v1859_v55 = vpack.c.bf16 %v573_v46, %v572_v47  ;;  %v1862_v3 = vpack.c.bf16 %v569_v50, %v568_v54 }
  0xe4   : > { %v2243_v56 = vunpack.i.h.bf16 %v2241_v53  ;;  %v2242_v57 = vunpack.i.l.bf16 %v2241_v53  ;;  %v547_v41 = vpack.c.bf16 %v2763_v1, %v2760_v0  ;;  %v545_v46 = vpack.c.bf16 %v2771_v4, %v2766_v2  ;;  %v2427_v0 = vld [vmem:[#allocation2] ss:$12 sps:$4 sm:$0xff]   ;;  %v2431_v1 = vld [vmem:[#allocation2 + $0x1c] ss:$12 sps:$4 sm:$0xff]  }
  0xe5   : > { %1857 = vmatpush2.bf16.msk.msra.mxu0 %vm2845_vm6, %v1856_v58  ;;  %vm1047_vm5 = vcmp.lt.s32.totalorder %v2810_v19, 2  ;;  %vm926_vm6 = vcmp.ge.s32.totalorder %v2816_v23, 2 }
  0xe6   : > { %v567_v59 = vsel %vm565_vm2, %v2238_v51, %v2243_v56  ;;  %v571_v60 = vsel %vm565_vm2, %v2243_v56, %v2238_v51  ;;  %v566_v61 = vsel %vm565_vm2, %v2237_v52, %v2242_v57  ;;  %v570_v62 = vsel %vm565_vm2, %v2242_v57, %v2237_v52  ;;  %v2246_v63 = vpop.permute.xlu0 %2245  ;;  %1860 = vmatprep.subr.msk.bf16.mxu0 %vm2876_vm9, %v1859_v55  ;;  %vm3133_vm8 = vmpackc.low %vm926_vm6, %vm926_vm6 }
  0xe7   : > { %v2248_v45 = vunpack.i.h.bf16 %v2246_v63  ;;  %v2247_v7 = vunpack.i.l.bf16 %v2246_v63  ;;  %v2251_v10 = vpop.permute.xlu1 %2250  ;;  %v1865_v11 = vpack.c.bf16 %v571_v60, %v570_v62  ;;  %v1868_v16 = vpack.c.bf16 %v567_v59, %v566_v61 }
  0xe8   : > { %v2253_v14 = vunpack.i.h.bf16 %v2251_v10  ;;  %v2252_v15 = vunpack.i.l.bf16 %v2251_v10  ;;  %vm914_vm2 = vcmp.lt.s32.totalorder %v2810_v19, 34 }
  0xe9   : > { %1863 = vmatpush2.bf16.msk.msra.mxu0 %vm2900_vm11, %v1862_v3 }
  0xea   : > { %v2256_v18 = vpop.permute.xlu0 %2255  ;;  %v693_v49 = vsel %vm686_vm3, %v2252_v15, %v2247_v7  ;;  %v694_v21 = vsel %vm686_vm3, %v2253_v14, %v2248_v45  ;;  %v689_v22 = vsel %vm686_vm3, %v2247_v7, %v2252_v15  ;;  %v690_v25 = vsel %vm686_vm3, %v2248_v45, %v2253_v14  ;;  %1866 = vmatprep.subr.msk.bf16.mxu0 %vm2876_vm9, %v1865_v11 }
  0xeb   : > { %v2258_v26 = vunpack.i.h.bf16 %v2256_v18  ;;  %v2257_v27 = vunpack.i.l.bf16 %v2256_v18  ;;  %v2261_v28 = vpop.permute.xlu1 %2260  ;;  %v700_v5 = vsel %vm612_vm15, %v693_v49, 0.0  ;;  %v702_v6 = vsel %vm612_vm15, %v694_v21, 0.0 }
  0xec   : > { %v2263_v29 = vunpack.i.h.bf16 %v2261_v28  ;;  %v2262_v30 = vunpack.i.l.bf16 %v2261_v28  ;;  %v1871_v31 = vpack.c.bf16 %v702_v6, %v700_v5  ;;  %v1874_v33 = vpack.c.bf16 %v690_v25, %v689_v22 }
  0xed   : > { %1869 = vmatpush2.bf16.msk.msra.mxu0 %vm2900_vm11, %v1868_v16 }
  0xee   : > { %v688_v34 = vsel %vm686_vm3, %v2258_v26, %v2263_v29  ;;  %v692_v35 = vsel %vm686_vm3, %v2263_v29, %v2258_v26  ;;  %v687_v36 = vsel %vm686_vm3, %v2257_v27, %v2262_v30  ;;  %v691_v37 = vsel %vm686_vm3, %v2262_v30, %v2257_v27  ;;  %1872 = vmatprep.subr.msk.bf16.mxu1 %vm2876_vm9, %v1871_v31 }
  0xef   : > { %v698_v38 = vsel %vm612_vm15, %v692_v35, 0.0  ;;  %v696_v39 = vsel %vm612_vm15, %v691_v37, 0.0  ;;  %v1880_v40 = vpack.c.bf16 %v688_v34, %v687_v36  ;;  %1875 = vmatpush1.bf16.msk.msra.mxu1 %vm2900_vm11, %v1874_v33  ;;  %812 = vmatprep.subr.bf16.mxu0 %v548_v17  ;;  %vm3180_vm15 = vmpackc.low %vm1009_vm13, %vm1009_vm13  ;;  %vm1172_vm3 = vcmp.lt.s32.totalorder %v2810_v19, 96 }
  0xf0   : > { %v1877_v42 = vpack.c.bf16 %v698_v38, %v696_v39 }
  0xf1   : > { %813 = vmatpush2.bf16.msra.mxu0 %v547_v41 }
  0xf2   : > { %1878 = vmatprep.subr.msk.bf16.mxu1 %vm2876_vm9, %v1877_v42  ;;  %814 = vmatprep.subr.bf16.mxu0 %v546_v43  ;;  %v2436_v43 = vld [vmem:[#allocation5 + $0x4] ss:$12 sps:$4 sm:$0xff]   ;;  %vm3137_vm9 = vmpackc.low %vm925_vm7, %vm925_vm7  ;;  %vm1125_vm7 = vcmp.lt.s32.totalorder %v2810_v19, 98 }
  0xf3   : > { %1881 = vmatpush1.bf16.msk.msra.mxu1 %vm2900_vm11, %v1880_v40  ;;  %vm1000_vm11 = vcmp.lt.s32.totalorder %v2810_v19, 30 }
  0xf5   : > { %815 = vmatpush2.bf16.msra.mxu0 %v545_v46  ;;  %v1248_v46 = vld [vmem:[%s3521_s4 + $0x10] sm:$0xff] }
  0xf6   : > { %1882 = vmatmul.mubr.msk.bf16.vlgmr.msra.gmra.mxu1 %vm777_vm4, %v2426_v44  ;;  %v1249_v44 = vld [vmem:[%s3521_s4 + $0x18] sm:$0xff] }
  0xf7   : > { %879 = vmatprep.mubr.bf16.mxu1 %v2600_v12  ;;  %v740_v4 = vpop.permute.xlu0 %739 }
  0xf8   : > { %817 = vmatmul.mubr.bf16.vlgmr.msra.gmra.mxu0 %v2427_v0  ;;  %v745_v48 = vpop.permute.xlu1 %744  ;;  %v1247_v0 = vld [vmem:[%s3521_s4 + $0x8] sm:$0xff] }
  0xf9   : > { %826 = vmatprep.mubr.bf16.mxu0 %v2431_v1  ;;  %v1246_v1 = vld [vmem:[%s3521_s4] sm:$0xff] }
  0xfb   : > { %v735_v54 = vpop.permute.xlu0 %734 }
  0xfc   : > { %v730_v56 = vpop.permute.xlu1 %729 }
  0xfe   : > { %1883 = vmatmul.mubr.msk.bf16.gmra.mxu1 %vm777_vm4, %v2430_v8 }
  0xff   : > { %1338 = vmatprep.mubr.bf16.mxu1 %v2436_v43 }
 0x100   : > { %827 = vmatmul.mubr.bf16.gmra.mxu0 %v2433_v9 }
 0x101   : > { %1391 = vmatprep.mubr.bf16.mxu0 %v2600_v12 }
 0x1b6   : > { %v871_v13 = vpop.f32.mrf.mxu1 }
 0x1b8   : > { %v873_v2 = vpop.f32.mrf.mxu1  ;;  %v818_v32 = vpop.f32.mrf.mxu0 }
 0x1b9   : > { %v819_v14 = vadd.f32 %v818_v32, %v730_v56 }
 0x1ba   : > { %v875_v47 = vpop.f32.mrf.mxu1  ;;  %v820_v50 = vpop.f32.mrf.mxu0 }
 0x1bb   : > { %v821_v58 = vadd.f32 %v820_v50, %v730_v56  ;;  %v872_v28 = vadd.f32 %v871_v13, %v819_v14 }
 0x1bc   : > { %v877_v51 = vpop.f32.mrf.mxu1  ;;  %v822_v52 = vpop.f32.mrf.mxu0 }
 0x1bd   : > { %v823_v3 = vadd.f32 %v822_v52, %v735_v54  ;;  %v874_v7 = vadd.f32 %v873_v2, %v821_v58  ;;  %v890_v36 = vmax.f32 %v872_v28, 0.0 }
 0x1be   : > { %v881_v53 = vpop.f32.mrf.mxu1  ;;  %v824_v55 = vpop.f32.mrf.mxu0 }
 0x1bf   : > { %v825_v57 = vadd.f32 %v824_v55, %v735_v54  ;;  %v876_v49 = vadd.f32 %v875_v47, %v823_v3  ;;  %v891_v26 = vmax.f32 %v874_v7, 0.0 }
 0x1c0   : > { %v883_v59 = vpop.f32.mrf.mxu1  ;;  %v828_v60 = vpop.f32.mrf.mxu0 }
 0x1c1   : > { %v829_v61 = vadd.f32 %v828_v60, %v740_v4  ;;  %v878_v62 = vadd.f32 %v877_v51, %v825_v57  ;;  %v892_v31 = vmax.f32 %v876_v49, 0.0 }
 0x1c2   : > { %v830_v63 = vpop.f32.mrf.mxu0  ;;  %v885_v10 = vpop.f32.mrf.mxu1 }
 0x1c3   : > { %v831_v45 = vadd.f32 %v830_v63, %v740_v4  ;;  %v882_v15 = vadd.f32 %v881_v53, %v829_v61  ;;  %v893_v17 = vmax.f32 %v878_v62, 0.0  ;;  %v2271_v38 = vpack.i.bf16 %v892_v31, %v890_v36 }
 0x1c4   : > { %v832_v11 = vpop.f32.mrf.mxu0  ;;  %v887_v27 = vpop.f32.mrf.mxu1  ;;  %v3108_v41 = vpack.c.bf16 %v892_v31, %v890_v36 }
 0x1c5   : > { %v833_v16 = vadd.f32 %v832_v11, %v745_v48  ;;  %v884_v21 = vadd.f32 %v883_v59, %v831_v45  ;;  %v894_v5 = vmax.f32 %v882_v15, 0.0  ;;  %v3102_v30 = vpack.c.bf16 %v893_v17, %v891_v26 }
 0x1c6   : > { %v834_v18 = vpop.f32.mrf.mxu0  ;;  %v2281_v42 = vpack.i.bf16 %v893_v17, %v891_v26 }
 0x1c7   : > { %v886_v22 = vadd.f32 %v885_v10, %v833_v16  ;;  %v835_v25 = vadd.f32 %v834_v18, %v745_v48  ;;  %v895_v33 = vmax.f32 %v884_v21, 0.0 }
 0x1c9   : > { %v896_v6 = vmax.f32 %v886_v22, 0.0  ;;  %v888_v29 = vadd.f32 %v887_v27, %v835_v25 }
 0x1cb   : > { %v897_v34 = vmax.f32 %v888_v29, 0.0  ;;  %v2266_v35 = vpack.i.bf16 %v896_v6, %v894_v5  ;;  %v3106_v40 = vpack.c.bf16 %v896_v6, %v894_v5 }
 0x1cd   : > { %2267 = vrot.lane.b32.xlu1 %v2266_v35, %s2601_s25  ;;  %v2276_v37 = vpack.i.bf16 %v897_v34, %v895_v33  ;;  %v3104_v39 = vpack.c.bf16 %v897_v34, %v895_v33 }
 0x1cf   : > { %2277 = vrot.lane.b32.xlu0 %v2276_v37, %s2601_s25 }
 0x1d1   : > { %2272 = vrot.lane.b32.xlu1 %v2271_v38, %s2601_s25 }
 0x1d3   : > { %2282 = vrot.lane.b32.xlu0 %v2281_v42, %s2601_s25 }
 0x1d5   : > { %2287 = vrot.lane.b32.xlu1 %v2266_v35, %s2602_s23 }
 0x1d7   : > { %2297 = vrot.lane.b32.xlu0 %v2276_v37, %s2602_s23 }
 0x1d9   : > { %2292 = vrot.lane.b32.xlu1 %v2271_v38, %s2602_s23 }
 0x1db   : > { %2302 = vrot.lane.b32.xlu0 %v2281_v42, %s2602_s23 }
 0x1dd   : > { %2307 = vrot.lane.b32.xlu1 %v2266_v35, %s2603_s24 }
 0x1df   : > { %2317 = vrot.lane.b32.xlu0 %v2276_v37, %s2603_s24 }
 0x1e1   : > { %2312 = vrot.lane.b32.xlu1 %v2271_v38, %s2603_s24 }
 0x1e3   : > { %2322 = vrot.lane.b32.xlu0 %v2281_v42, %s2603_s24 }
 0x1e5   : > { %2327 = vrot.lane.b32.xlu1 %v2266_v35, %s2604_s26 }
 0x1e7   : > { %2337 = vrot.lane.b32.xlu0 %v2276_v37, %s2604_s26 }
 0x1e9   : > { %2332 = vrot.lane.b32.xlu1 %v2271_v38, %s2604_s26 }
 0x1eb   : > { %2342 = vrot.lane.b32.xlu0 %v2281_v42, %s2604_s26  ;;  %s3466_s26 = scalar_lea.hbm %s3526_s9, %s1992_s22 }
 0x1ed   : > { %2347 = vrot.lane.b32.xlu1 %v2266_v35, %s2605_s21 }
 0x1ef   : > { %2357 = vrot.lane.b32.xlu0 %v2276_v37, %s2605_s21 }
 0x1f1   : > { %2352 = vrot.lane.b32.xlu1 %v2271_v38, %s2605_s21 }
 0x1f3   : > { %2362 = vrot.lane.b32.xlu0 %v2281_v42, %s2605_s21 }
 0x1f5   : > { %2367 = vrot.lane.b32.xlu1 %v2266_v35, %s2606_s28 }
 0x1f7   : > { %2377 = vrot.lane.b32.xlu0 %v2276_v37, %s2606_s28 }
 0x1f9   : > { %2372 = vrot.lane.b32.xlu1 %v2271_v38, %s2606_s28 }
 0x1fb   : > { %2382 = vrot.lane.b32.xlu0 %v2281_v42, %s2606_s28  ;;  %s2611_s28 = smov [#allocation7]  }
 0x1fd   : > { %2387 = vrot.lane.b32.xlu1 %v2266_v35, %s2607_s29 }
 0x1ff   : > { %2397 = vrot.lane.b32.xlu0 %v2276_v37, %s2607_s29 }
 0x201   : > { %2392 = vrot.lane.b32.xlu1 %v2271_v38, %s2607_s29 }
 0x203   : > { %2402 = vrot.lane.b32.xlu0 %v2281_v42, %s2607_s29  ;;  %s353_s29 = sand.u32 1, %s2578_s10  }
 0x204   : > { %s3476_s13 = scalar_lea.sflag [#allocation4], %s353_s29 }
 0x205   : > { %2407 = vrot.lane.b32.xlu1 %v2266_v35, %s2608_s16 }
 0x207   : > { %2417 = vrot.lane.b32.xlu0 %v2276_v37, %s2608_s16 }
 0x209   : > { %2412 = vrot.lane.b32.xlu1 %v2271_v38, %s2608_s16 }
 0x20b   : > { %2422 = vrot.lane.b32.xlu0 %v2281_v42, %s2608_s16  ;;  %s1789_s16 = sshll.u32 %s353_s29, 6 }
 0x20c   : > { %s355_s17 = scalar_lea.vmem [#allocation7], %s1789_s16 }
 0x20d   : > { %1267 = vperm.xlu1 %2265, %v1249_v44   ;;  %s1697_s25 = sshll.u32 %s355_s17, 4  ;;  %s3472_s25 = int_to_ptr.vmem [resolvable:$true] %s1697_s25 }
 0x20e   : > { %s2518_s21 = scalar_lea.vmem %s3472_s25, 1024 }
 0x20f   : > { %1262 = vperm.xlu0 %2264, %v1248_v46   ;;  %p2519_p10 = scmp.ne.s32.totalorder %s3472_s25, %s2518_s21 }
 0x211   : > { %1257 = vperm.xlu1 %2265, %v1247_v0   ;;  %p2520_p12 = pnand %p2519_p10, %p2701_p5 }
 0x213   : > { %1252 = vperm.xlu0 %2264, %v1246_v1   ;;  %p2521_p8 = pneg %p2520_p12 }
 0x23f   : > { %v2268_v8 = vpop.permute.xlu1 %2267 }
 0x240   : > { %v2270_v13 = vunpack.i.h.bf16 %v2268_v8  ;;  %v2269_v2 = vunpack.i.l.bf16 %v2268_v8 }
 0x241   : > { %v2278_v9 = vpop.permute.xlu0 %2277 }
 0x242   : > { %v2280_v4 = vunpack.i.h.bf16 %v2278_v9  ;;  %v2279_v32 = vunpack.i.l.bf16 %v2278_v9 }
 0x243   : > { %v2273_v47 = vpop.permute.xlu1 %2272 }
 0x244   : > { %v1050_v48 = vsel %vm1047_vm5, %v2269_v2, %v2279_v32  ;;  %v1051_v50 = vsel %vm1047_vm5, %v2270_v13, %v2280_v4  ;;  %v1054_v51 = vsel %vm1047_vm5, %v2279_v32, %v2269_v2  ;;  %v1055_v52 = vsel %vm1047_vm5, %v2280_v4, %v2270_v13 }
 0x245   : > { %v1891_v54 = vpack.c.bf16 %v1051_v50, %v1050_v48  ;;  %v1894_v55 = vpack.c.bf16 %v1055_v52, %v1054_v51  ;;  %v2283_v56 = vpop.permute.xlu0 %2282  ;;  %v2275_v58 = vunpack.i.h.bf16 %v2273_v47  ;;  %v2274_v59 = vunpack.i.l.bf16 %v2273_v47 }
 0x246   : > { %v2285_v60 = vunpack.i.h.bf16 %v2283_v56  ;;  %v2284_v61 = vunpack.i.l.bf16 %v2283_v56 }
 0x247   : > { %1892 = vmatprep.subr.msk.bf16.mxu1 %vm3133_vm8, %v1891_v54  ;;  %v2288_v62 = vpop.permute.xlu1 %2287 }
 0x248   : > { %v1048_v63 = vsel %vm1047_vm5, %v2274_v59, %v2284_v61  ;;  %v1049_v3 = vsel %vm1047_vm5, %v2275_v58, %v2285_v60  ;;  %v1052_v45 = vsel %vm1047_vm5, %v2284_v61, %v2274_v59  ;;  %v1053_v7 = vsel %vm1047_vm5, %v2285_v60, %v2275_v58  ;;  %1895 = vmatpush1.bf16.msk.msra.mxu1 %vm3137_vm9, %v1894_v55 }
 0x249   : > { %v1897_v10 = vpack.c.bf16 %v1049_v3, %v1048_v63  ;;  %v1900_v11 = vpack.c.bf16 %v1053_v7, %v1052_v45  ;;  %v2298_v14 = vpop.permute.xlu0 %2297  ;;  %v2290_v15 = vunpack.i.h.bf16 %v2288_v62  ;;  %v2289_v16 = vunpack.i.l.bf16 %v2288_v62 }
 0x24a   : > { %v2300_v17 = vunpack.i.h.bf16 %v2298_v14  ;;  %v2299_v18 = vunpack.i.l.bf16 %v2298_v14  ;;  %vm1135_vm5 = vcmp.lt.s32.totalorder %v2813_v20, 224  ;;  %v2438_v20 = vld [vmem:[#allocation5 + $0x1c] ss:$12 sps:$4 sm:$0xff]  }
 0x24b   : > { %v2293_v49 = vpop.permute.xlu1 %2292  ;;  %1898 = vmatprep.subr.msk.bf16.mxu1 %vm3133_vm8, %v1897_v10  ;;  %vm3276_vm6 = vmpackc.low %vm1135_vm5, %vm1135_vm5 }
 0x24c   : > { %v1003_v21 = vsel %vm1000_vm11, %v2289_v16, %v2299_v18  ;;  %v1004_v22 = vsel %vm1000_vm11, %v2290_v15, %v2300_v17  ;;  %v1007_v25 = vsel %vm1000_vm11, %v2299_v18, %v2289_v16  ;;  %v1008_v23 = vsel %vm1000_vm11, %v2300_v17, %v2290_v15  ;;  %1901 = vmatpush1.bf16.msk.msra.mxu1 %vm3137_vm9, %v1900_v11 }
 0x24d   : > { %v1015_v27 = vsel %vm923_vm10, %v1007_v25, 0.0  ;;  %v1017_v28 = vsel %vm923_vm10, %v1008_v23, 0.0  ;;  %v1903_v5 = vpack.c.bf16 %v1004_v22, %v1003_v21  ;;  %v2295_v6 = vunpack.i.h.bf16 %v2293_v49  ;;  %v2303_v29 = vpop.permute.xlu0 %2302 }
 0x24e   : > { %v1906_v33 = vpack.c.bf16 %v1017_v28, %v1015_v27  ;;  %v2294_v34 = vunpack.i.l.bf16 %v2293_v49  ;;  %v2305_v35 = vunpack.i.h.bf16 %v2303_v29  ;;  %v2304_v36 = vunpack.i.l.bf16 %v2303_v29 }
 0x24f   : > { %v2308_v37 = vpop.permute.xlu1 %2307  ;;  %1904 = vmatprep.subr.msk.bf16.mxu1 %vm3169_vm14, %v1903_v5 }
 0x250   : > { %v1001_v38 = vsel %vm1000_vm11, %v2294_v34, %v2304_v36  ;;  %v1002_v24 = vsel %vm1000_vm11, %v2295_v6, %v2305_v35  ;;  %v1005_v42 = vsel %vm1000_vm11, %v2304_v36, %v2294_v34  ;;  %v1006_v43 = vsel %vm1000_vm11, %v2305_v35, %v2295_v6  ;;  %1907 = vmatpush1.bf16.msk.msra.mxu1 %vm3180_vm15, %v1906_v33 }
 0x251   : > { %v1011_v44 = vsel %vm923_vm10, %v1005_v42, 0.0  ;;  %v1013_v46 = vsel %vm923_vm10, %v1006_v43, 0.0  ;;  %v1909_v0 = vpack.c.bf16 %v1002_v24, %v1001_v38  ;;  %v2310_v1 = vunpack.i.h.bf16 %v2308_v37  ;;  %v2318_v8 = vpop.permute.xlu0 %2317 }
 0x252   : > { %v1912_v9 = vpack.c.bf16 %v1013_v46, %v1011_v44  ;;  %v2309_v13 = vunpack.i.l.bf16 %v2308_v37  ;;  %v2320_v2 = vunpack.i.h.bf16 %v2318_v8  ;;  %v2319_v4 = vunpack.i.l.bf16 %v2318_v8 }
 0x253   : > { %v2313_v32 = vpop.permute.xlu1 %2312  ;;  %1910 = vmatprep.subr.msk.bf16.mxu1 %vm3169_vm14, %v1909_v0  ;;  %vm1513_vm11 = vcmask 15360  }
 0x254   : > { %v970_v47 = vsel %vm963_vm0, %v2319_v4, %v2309_v13  ;;  %v971_v48 = vsel %vm963_vm0, %v2320_v2, %v2310_v1  ;;  %1913 = vmatpush1.bf16.msk.msra.mxu1 %vm3180_vm15, %v1912_v9  ;;  %v2315_v51 = vunpack.i.h.bf16 %v2313_v32  ;;  %v966_v54 = vsel %vm963_vm0, %v2309_v13, %v2319_v4 }
 0x255   : > { %v1915_v50 = vpack.c.bf16 %v971_v48, %v970_v47  ;;  %v2323_v52 = vpop.permute.xlu0 %2322  ;;  %v967_v55 = vsel %vm963_vm0, %v2310_v1, %v2320_v2  ;;  %v2314_v56 = vunpack.i.l.bf16 %v2313_v32 }
 0x256   : > { %v2325_v58 = vunpack.i.h.bf16 %v2323_v52  ;;  %v2324_v59 = vunpack.i.l.bf16 %v2323_v52  ;;  %v983_v60 = vpack.c.bf16 %v967_v55, %v966_v54 }
 0x257   : > { %v2328_v62 = vpop.permute.xlu1 %2327 }
 0x258   : > { %v968_v63 = vsel %vm963_vm0, %v2324_v59, %v2314_v56  ;;  %v969_v3 = vsel %vm963_vm0, %v2325_v58, %v2315_v51  ;;  %1314 = vmatprep.subr.bf16.mxu1 %v983_v60  ;;  %v2330_v7 = vunpack.i.h.bf16 %v2328_v62  ;;  %v964_v11 = vsel %vm963_vm0, %v2314_v56, %v2324_v59 }
 0x259   : > { %v1918_v45 = vpack.c.bf16 %v969_v3, %v968_v63  ;;  %1916 = vmatpush1.bf16.msk.msra.mxu1 %vm3216_vm1, %v1915_v50  ;;  %v2338_v10 = vpop.permute.xlu0 %2337  ;;  %v965_v14 = vsel %vm963_vm0, %v2315_v51, %v2325_v58  ;;  %v2329_v15 = vunpack.i.l.bf16 %v2328_v62 }
 0x25a   : > { %v2340_v16 = vunpack.i.h.bf16 %v2338_v10  ;;  %v2339_v17 = vunpack.i.l.bf16 %v2338_v10  ;;  %v981_v18 = vpack.c.bf16 %v965_v14, %v964_v11 }
 0x25b   : > { %v2333_v49 = vpop.permute.xlu1 %2332 }
 0x25c   : > { %v917_v21 = vsel %vm914_vm2, %v2329_v15, %v2339_v17  ;;  %v918_v22 = vsel %vm914_vm2, %v2330_v7, %v2340_v16  ;;  %v921_v25 = vsel %vm914_vm2, %v2339_v17, %v2329_v15  ;;  %v922_v23 = vsel %vm914_vm2, %v2340_v16, %v2330_v7  ;;  %1316 = vmatprep.subr.bf16.mxu1 %v981_v18 }
 0x25d   : > { %v931_v27 = vsel %vm923_vm10, %v921_v25, 0.0  ;;  %v933_v28 = vsel %vm923_vm10, %v922_v23, 0.0  ;;  %v1921_v5 = vpack.c.bf16 %v918_v22, %v917_v21  ;;  %v2335_v6 = vunpack.i.h.bf16 %v2333_v49  ;;  %1919 = vmatpush1.bf16.msk.msra.mxu1 %vm3216_vm1, %v1918_v45  ;;  %v2343_v29 = vpop.permute.xlu0 %2342 }
 0x25e   : > { %v1924_v33 = vpack.c.bf16 %v933_v28, %v931_v27  ;;  %v2334_v34 = vunpack.i.l.bf16 %v2333_v49  ;;  %v2345_v35 = vunpack.i.h.bf16 %v2343_v29  ;;  %v2344_v36 = vunpack.i.l.bf16 %v2343_v29 }
 0x25f   : > { %v2348_v37 = vpop.permute.xlu1 %2347  ;;  %1922 = vmatprep.subr.msk.bf16.mxu1 %vm3133_vm8, %v1921_v5 }
 0x260   : > { %v915_v38 = vsel %vm914_vm2, %v2334_v34, %v2344_v36  ;;  %v916_v24 = vsel %vm914_vm2, %v2335_v6, %v2345_v35  ;;  %v919_v42 = vsel %vm914_vm2, %v2344_v36, %v2334_v34  ;;  %v920_v43 = vsel %vm914_vm2, %v2345_v35, %v2335_v6 }
 0x261   : > { %v927_v44 = vsel %vm923_vm10, %v919_v42, 0.0  ;;  %v929_v46 = vsel %vm923_vm10, %v920_v43, 0.0  ;;  %v1927_v0 = vpack.c.bf16 %v916_v24, %v915_v38  ;;  %v2350_v1 = vunpack.i.h.bf16 %v2348_v37  ;;  %1925 = vmatpush1.bf16.msk.msra.mxu1 %vm3137_vm9, %v1924_v33  ;;  %v2358_v8 = vpop.permute.xlu0 %2357 }
 0x262   : > { %v1930_v9 = vpack.c.bf16 %v929_v46, %v927_v44  ;;  %v2349_v13 = vunpack.i.l.bf16 %v2348_v37  ;;  %v2360_v2 = vunpack.i.h.bf16 %v2358_v8  ;;  %v2359_v4 = vunpack.i.l.bf16 %v2358_v8 }
 0x263   : > { %v2353_v32 = vpop.permute.xlu1 %2352  ;;  %1928 = vmatprep.subr.msk.bf16.mxu1 %vm3133_vm8, %v1927_v0  ;;  %vm1088_vm10 = vcmp.lt.s32.totalorder %v2810_v19, 126 }
 0x264   : > { %v1175_v47 = vsel %vm1172_vm3, %v2349_v13, %v2359_v4  ;;  %v1176_v48 = vsel %vm1172_vm3, %v2350_v1, %v2360_v2  ;;  %v1179_v50 = vsel %vm1172_vm3, %v2359_v4, %v2349_v13  ;;  %v1180_v51 = vsel %vm1172_vm3, %v2360_v2, %v2350_v1 }
 0x265   : > { %v1191_v54 = vpack.c.bf16 %v1176_v48, %v1175_v47  ;;  %v1933_v55 = vpack.c.bf16 %v1180_v51, %v1179_v50  ;;  %1931 = vmatpush1.bf16.msk.msra.mxu1 %vm3137_vm9, %v1930_v9  ;;  %v2363_v56 = vpop.permute.xlu0 %2362  ;;  %v2355_v58 = vunpack.i.h.bf16 %v2353_v32  ;;  %v2354_v59 = vunpack.i.l.bf16 %v2353_v32 }
 0x266   : > { %v2365_v60 = vunpack.i.h.bf16 %v2363_v56  ;;  %v2364_v61 = vunpack.i.l.bf16 %v2363_v56 }
 0x267   : > { %v2368_v62 = vpop.permute.xlu1 %2367  ;;  %1934 = vmatprep.subr.msk.bf16.mxu1 %vm3276_vm6, %v1933_v55 }
 0x268   : > { %v1173_v63 = vsel %vm1172_vm3, %v2354_v59, %v2364_v61  ;;  %v1174_v3 = vsel %vm1172_vm3, %v2355_v58, %v2365_v60  ;;  %v1177_v45 = vsel %vm1172_vm3, %v2364_v61, %v2354_v59  ;;  %v1178_v7 = vsel %vm1172_vm3, %v2365_v60, %v2355_v58 }
 0x269   : > { %v1189_v10 = vpack.c.bf16 %v1174_v3, %v1173_v63  ;;  %v1936_v11 = vpack.c.bf16 %v1178_v7, %v1177_v45  ;;  %1323 = vmatpush2.bf16.msra.mxu1 %v1191_v54  ;;  %v2378_v14 = vpop.permute.xlu0 %2377  ;;  %v2370_v15 = vunpack.i.h.bf16 %v2368_v62  ;;  %v2369_v16 = vunpack.i.l.bf16 %v2368_v62 }
 0x26a   : > { %v2380_v17 = vunpack.i.h.bf16 %v2378_v14  ;;  %v2379_v18 = vunpack.i.l.bf16 %v2378_v14 }
 0x26b   : > { %v2373_v49 = vpop.permute.xlu1 %2372  ;;  %1937 = vmatprep.subr.msk.bf16.mxu1 %vm3276_vm6, %v1936_v11 }
 0x26c   : > { %v1128_v21 = vsel %vm1125_vm7, %v2369_v16, %v2379_v18  ;;  %v1129_v22 = vsel %vm1125_vm7, %v2370_v15, %v2380_v17  ;;  %v1132_v25 = vsel %vm1125_vm7, %v2379_v18, %v2369_v16  ;;  %v1133_v23 = vsel %vm1125_vm7, %v2380_v17, %v2370_v15 }
 0x26d   : > { %v1141_v27 = vsel %vm1135_vm5, %v1132_v25, 0.0  ;;  %v1143_v28 = vsel %vm1135_vm5, %v1133_v23, 0.0  ;;  %v2375_v5 = vunpack.i.h.bf16 %v2373_v49  ;;  %1325 = vmatpush2.bf16.msra.mxu1 %v1189_v10  ;;  %v2383_v6 = vpop.permute.xlu0 %2382  ;;  %v2374_v29 = vunpack.i.l.bf16 %v2373_v49 }
 0x26e   : > { %v2385_v33 = vunpack.i.h.bf16 %v2383_v6  ;;  %v2384_v34 = vunpack.i.l.bf16 %v2383_v6  ;;  %v1939_v35 = vpack.c.bf16 %v1143_v28, %v1141_v27  ;;  %v1942_v36 = vpack.c.bf16 %v1129_v22, %v1128_v21 }
 0x26f   : > { %v2388_v37 = vpop.permute.xlu1 %2387 }
 0x270   : > { %v1126_v38 = vsel %vm1125_vm7, %v2374_v29, %v2384_v34  ;;  %v1127_v24 = vsel %vm1125_vm7, %v2375_v5, %v2385_v33  ;;  %v1130_v42 = vsel %vm1125_vm7, %v2384_v34, %v2374_v29  ;;  %v1131_v43 = vsel %vm1125_vm7, %v2385_v33, %v2375_v5  ;;  %1940 = vmatprep.subr.msk.bf16.mxu1 %vm3133_vm8, %v1939_v35 }
 0x271   : > { %v1137_v44 = vsel %vm1135_vm5, %v1130_v42, 0.0  ;;  %v1139_v46 = vsel %vm1135_vm5, %v1131_v43, 0.0  ;;  %v2390_v0 = vunpack.i.h.bf16 %v2388_v37  ;;  %v2398_v1 = vpop.permute.xlu0 %2397  ;;  %1943 = vmatpush2.bf16.msk.msra.mxu1 %vm3137_vm9, %v1942_v36  ;;  %v2389_v8 = vunpack.i.l.bf16 %v2388_v37  ;;  %v2437_v43 = vld [vmem:[#allocation5 + $0x8] ss:$12 sps:$4 sm:$0xff]  }
 0x272   : > { %v2400_v9 = vunpack.i.h.bf16 %v2398_v1  ;;  %v2399_v13 = vunpack.i.l.bf16 %v2398_v1  ;;  %v1945_v2 = vpack.c.bf16 %v1139_v46, %v1137_v44  ;;  %v1948_v4 = vpack.c.bf16 %v1127_v24, %v1126_v38 }
 0x273   : > { %v2393_v32 = vpop.permute.xlu1 %2392 }
 0x274   : > { %v1091_v47 = vsel %vm1088_vm10, %v2389_v8, %v2399_v13  ;;  %v1092_v48 = vsel %vm1088_vm10, %v2390_v0, %v2400_v9  ;;  %v1095_v50 = vsel %vm1088_vm10, %v2399_v13, %v2389_v8  ;;  %v1096_v51 = vsel %vm1088_vm10, %v2400_v9, %v2390_v0  ;;  %1946 = vmatprep.subr.msk.bf16.mxu1 %vm3133_vm8, %v1945_v2 }
 0x275   : > { %v1951_v52 = vpack.c.bf16 %v1096_v51, %v1095_v50  ;;  %v2403_v54 = vpop.permute.xlu0 %2402  ;;  %1949 = vmatpush2.bf16.msk.msra.mxu1 %vm3137_vm9, %v1948_v4  ;;  %v2395_v55 = vunpack.i.h.bf16 %v2393_v32  ;;  %v2394_v56 = vunpack.i.l.bf16 %v2393_v32  ;;  %v1954_v60 = vpack.c.bf16 %v1092_v48, %v1091_v47 }
 0x276   : > { %v2405_v58 = vunpack.i.h.bf16 %v2403_v54  ;;  %v2404_v59 = vunpack.i.l.bf16 %v2403_v54  ;;  %vm1209_vm8 = vcmp.lt.s32.totalorder %v2810_v19, 94  ;;  %v2434_v19 = vld [vmem:[#allocation5] ss:$12 sps:$4 sm:$0xff]   ;;  %vm2610_vm9 = vmmov 0  }
 0x277   : > { %v2408_v61 = vpop.permute.xlu1 %2407  ;;  %1952 = vmatprep.subr.msk.bf16.mxu1 %vm3169_vm14, %v1951_v52 }
 0x278   : > { %v1089_v62 = vsel %vm1088_vm10, %v2394_v56, %v2404_v59  ;;  %v1090_v53 = vsel %vm1088_vm10, %v2395_v55, %v2405_v58  ;;  %v1093_v63 = vsel %vm1088_vm10, %v2404_v59, %v2394_v56  ;;  %v1094_v57 = vsel %vm1088_vm10, %v2405_v58, %v2395_v55 }
 0x279   : > { %v1957_v3 = vpack.c.bf16 %v1094_v57, %v1093_v63  ;;  %v2418_v45 = vpop.permute.xlu0 %2417  ;;  %1955 = vmatpush2.bf16.msk.msra.mxu1 %vm3180_vm15, %v1954_v60  ;;  %v2410_v7 = vunpack.i.h.bf16 %v2408_v61  ;;  %v2409_v10 = vunpack.i.l.bf16 %v2408_v61  ;;  %v1960_v15 = vpack.c.bf16 %v1090_v53, %v1089_v62 }
 0x27a   : > { %v2420_v11 = vunpack.i.h.bf16 %v2418_v45  ;;  %v2419_v14 = vunpack.i.l.bf16 %v2418_v45 }
 0x27b   : > { %v2413_v16 = vpop.permute.xlu1 %2412  ;;  %1958 = vmatprep.subr.msk.bf16.mxu1 %vm3169_vm14, %v1957_v3 }
 0x27c   : > { %v1212_v17 = vsel %vm1209_vm8, %v2409_v10, %v2419_v14  ;;  %v1213_v18 = vsel %vm1209_vm8, %v2410_v7, %v2420_v11  ;;  %v1216_v49 = vsel %vm1209_vm8, %v2419_v14, %v2409_v10  ;;  %v1217_v21 = vsel %vm1209_vm8, %v2420_v11, %v2410_v7 }
 0x27d   : > { %v1223_v22 = vsel %vm1135_vm5, %v1216_v49, 0.0  ;;  %v1225_v25 = vsel %vm1135_vm5, %v1217_v21, 0.0  ;;  %v2415_v23 = vunpack.i.h.bf16 %v2413_v16  ;;  %v2423_v27 = vpop.permute.xlu0 %2422  ;;  %1961 = vmatpush2.bf16.msk.msra.mxu1 %vm3180_vm15, %v1960_v15  ;;  %v2414_v28 = vunpack.i.l.bf16 %v2413_v16 }
 0x27e   : > { %v2425_v5 = vunpack.i.h.bf16 %v2423_v27  ;;  %v2424_v6 = vunpack.i.l.bf16 %v2423_v27  ;;  %1334 = vmatprep.subr.bf16.mxu1 %v3104_v39  ;;  %v1963_v29 = vpack.c.bf16 %v1225_v25, %v1223_v22  ;;  %v1966_v33 = vpack.c.bf16 %v1213_v18, %v1212_v17 }
 0x27f   : > { %v2609_v49 = vmov 0.0  }
 0x280   : > { %v1210_v34 = vsel %vm1209_vm8, %v2414_v28, %v2424_v6  ;;  %v1211_v35 = vsel %vm1209_vm8, %v2415_v23, %v2425_v5  ;;  %v1214_v36 = vsel %vm1209_vm8, %v2424_v6, %v2414_v28  ;;  %v1215_v37 = vsel %vm1209_vm8, %v2425_v5, %v2415_v23  ;;  %1964 = vmatprep.subr.msk.bf16.mxu0 %vm3169_vm14, %v1963_v29  ;;  %v1429_v29 = vld [vmem:[%s3522_s5] sm:$0x3] }
 0x281   : > { %v1219_v39 = vsel %vm1135_vm5, %v1214_v36, 0.0  ;;  %v1221_v38 = vsel %vm1135_vm5, %v1215_v37, 0.0  ;;  %1335 = vmatpush2.bf16.msra.mxu1 %v3106_v40  ;;  %1967 = vmatpush1.bf16.msk.msra.mxu0 %vm3180_vm15, %v1966_v33  ;;  %v1972_v42 = vpack.c.bf16 %v1211_v35, %v1210_v34  ;;  %v2441_v40 = vld [vmem:[#allocation5 + $0x20] ss:$12 sps:$4 sm:$0xff]   ;;  %v1505_v33 = vld [vmem:[%s3524_s7] sm:$0xff] }
 0x282   : > { %1336 = vmatprep.subr.bf16.mxu1 %v3102_v30  ;;  %v1969_v24 = vpack.c.bf16 %v1221_v38, %v1219_v39  ;;  %v2440_v30 = vld [vmem:[#allocation5 + $0x18] ss:$12 sps:$4 sm:$0xff]   ;;  %v1430_v34 = vld [vmem:[%s3523_s6] sm:$0x3] }
 0x283   : > { %v1506_v38 = vld [vmem:[%s3524_s7 + $0x8] sm:$0xff] }
 0x284   : > { %1970 = vmatprep.subr.msk.bf16.mxu0 %vm3169_vm14, %v1969_v24  ;;  %v1507_v24 = vld [vmem:[%s3524_s7 + $0x10] sm:$0xff] }
 0x285   : > { %1337 = vmatpush2.bf16.msra.mxu1 %v3108_v41  ;;  %1973 = vmatpush1.bf16.msk.msra.mxu0 %vm3180_vm15, %v1972_v42  ;;  %v1508_v42 = vld [vmem:[%s3524_s7 + $0x18] sm:$0xff] }
 0x286   : > { %2003 = vmatprep.subr.mxu1 %v2609_v49 }
 0x288   : > { %1339 = vmatmul.mubr.bf16.vlgmr.msra.gmra.mxu1 %v2434_v19  ;;  %1974 = vmatmul.mubr.msk.bf16.vlgmr.msra.gmra.mxu0 %vm777_vm4, %v2437_v43  ;;  %v1268_v41 = vpop.permute.xlu1 %1267  ;;  %v1510_v19 = vld [vmem:[%s3525_s8 + $0x8] sm:$0xff] }
 0x289   : > { %1348 = vmatprep.mubr.bf16.mxu1 %v2438_v20  ;;  %1401 = vmatprep.mubr.bf16.mxu0 %v2600_v12  ;;  %v1509_v20 = vld [vmem:[%s3525_s8] sm:$0xff] }
 0x28a   : > { %v1263_v13 = vpop.permute.xlu0 %1262 }
 0x28c   : > { %v1258_v32 = vpop.permute.xlu1 %1257 }
 0x28e   : > { %v1253_v60 = vpop.permute.xlu0 %1252 }
 0x290   : > { %1349 = vmatmul.mubr.bf16.gmra.mxu1 %v2440_v30  ;;  %1975 = vmatmul.mubr.msk.bf16.gmra.mxu0 %vm777_vm4, %v2441_v40 }
 0x291   : > { %2011 = vmatprep.mubr.msk.f32.mxu1 %vm2610_vm9, %v2609_v49 }
 0x348   : > { %v1340_v26 = vpop.f32.mrf.mxu1  ;;  %v1393_v44 = vpop.f32.mrf.mxu0 }
 0x349   : > { %v1341_v45 = vadd.f32 %v1340_v26, %v1253_v60  ;;  %v1512_v26 = vld [vmem:[%s3525_s8 + $0x18] sm:$0xff] }
 0x34a   : > { %v1342_v46 = vpop.f32.mrf.mxu1  ;;  %v1395_v0 = vpop.f32.mrf.mxu0 }
 0x34b   : > { %v1343_v62 = vadd.f32 %v1342_v46, %v1253_v60  ;;  %v3412_v17 = vadd.f32 %v1393_v44, %v1341_v45 }
 0x34c   : > { %v1344_v1 = vpop.f32.mrf.mxu1  ;;  %v1397_v31 = vpop.f32.mrf.mxu0 }
 0x34d   : > { %v1345_v55 = vadd.f32 %v1344_v1, %v1258_v32  ;;  %v3406_v14 = vadd.f32 %v1395_v0, %v1343_v62 }
 0x34e   : > { %v1346_v8 = vpop.f32.mrf.mxu1  ;;  %v1399_v9 = vpop.f32.mrf.mxu0 }
 0x34f   : > { %v1347_v50 = vadd.f32 %v1346_v8, %v1258_v32  ;;  %v3400_v7 = vadd.f32 %v1397_v31, %v1345_v55  ;;  %v1412_v18 = vadd.f32 %v3406_v14, %v3412_v17 }
 0x350   : > { %v1350_v2 = vpop.f32.mrf.mxu1  ;;  %v1403_v4 = vpop.f32.mrf.mxu0 }
 0x351   : > { %v1351_v47 = vadd.f32 %v1350_v2, %v1263_v13  ;;  %v3396_v53 = vadd.f32 %v1399_v9, %v1347_v50 }
 0x352   : > { %v1352_v12 = vpop.f32.mrf.mxu1  ;;  %v1405_v48 = vpop.f32.mrf.mxu0 }
 0x353   : > { %v1353_v51 = vadd.f32 %v1352_v12, %v1263_v13  ;;  %v3392_v56 = vadd.f32 %v1403_v4, %v1351_v47  ;;  %v1415_v16 = vadd.f32 %v3396_v53, %v3400_v7 }
 0x354   : > { %v1354_v52 = vpop.f32.mrf.mxu1  ;;  %v1407_v54 = vpop.f32.mrf.mxu0 }
 0x355   : > { %v3394_v58 = vadd.f32 %v1405_v48, %v1353_v51  ;;  %v1355_v59 = vadd.f32 %v1354_v52, %v1268_v41 }
 0x356   : > { %v1356_v61 = vpop.f32.mrf.mxu1  ;;  %v1409_v3 = vpop.f32.mrf.mxu0 }
 0x357   : > { %v1357_v63 = vadd.f32 %v1356_v61, %v1268_v41  ;;  %v1418_v57 = vadd.f32 %v3394_v58, %v3392_v56  ;;  %v3402_v10 = vadd.f32 %v1407_v54, %v1355_v59  ;;  %v1511_v41 = vld [vmem:[%s3525_s8 + $0x10] sm:$0xff] }
 0x359   : > { %v3404_v11 = vadd.f32 %v1409_v3, %v1357_v63  ;;  %1419 = vadd.xlane.f32.xlu0 %v1418_v57  ;;  %v2458_v3 = vld [vmem:[%s2757_s27 + $0x10] sm:$0xff] }
 0x35b   : > { %v1421_v15 = vadd.f32 %v3404_v11, %v3402_v10 }
 0x35d   : > { %1422 = vadd.xlane.f32.xlu1 %v1421_v15  ;;  %1416 = vadd.xlane.f32.xlu0 %v1415_v16  ;;  %v2459_v15 = vld [vmem:[%s2757_s27 + $0x18] sm:$0xff] }
 0x361   : > { %1413 = vadd.xlane.f32.xlu1 %v1412_v18 }
 0x3e2   : > { %v1420_v21 = vpop.xlane.xlu0 %1419 }
 0x3e3   : > { %v1427_v27 = vmul.f32 0.00390625, %v1420_v21  ;;  %v2460_v21 = vld [vmem:[%s2757_s27] sm:$0xff] }
 0x3e6   : > { %v1423_v22 = vpop.xlane.xlu1 %1422  ;;  %v1417_v23 = vpop.xlane.xlu0 %1416 }
 0x3e7   : > { %v1428_v25 = vmul.f32 0.00390625, %v1423_v22  ;;  %v1426_v5 = vmul.f32 0.00390625, %v1417_v23 }
 0x3e9   : > { %2004 = vmatpush3.msra.mxu1 %v1428_v25 }
 0x3ea   : > { %2005 = vmatprep.subr.mxu1 %v2609_v49  ;;  %v1414_v28 = vpop.xlane.xlu1 %1413 }
 0x3eb   : > { %2006 = vmatpush3.msra.mxu1 %v1427_v27  ;;  %v1425_v6 = vmul.f32 0.00390625, %v1414_v28 }
 0x3ec   : > { %2007 = vmatprep.subr.mxu1 %v2609_v49 }
 0x3ed   : > { %2008 = vmatpush3.msra.mxu1 %v1426_v5  ;;  %v2462_v5 = vld [vmem:[%s2757_s27 + $0x20] sm:$0xff] }
 0x3ee   : > { %2009 = vmatprep.subr.mxu1 %v2609_v49 }
 0x3ef   : > { %2010 = vmatpush3.msra.mxu1 %v1425_v6 }
 0x3f0   : > { %2012 = vmatmul.mubr.msk.f32.vlgmr.msra.gmra.mxu1 %vm777_vm4, %v1429_v29  ;;  %v2463_v29 = vld [vmem:[%s2757_s27 + $0x28] sm:$0xff] }
 0x3f1   : > { %2016 = vmatprep.mubr.msk.f32.mxu1 %vm1513_vm11, %v1505_v33 }
 0x4b0   : > { %v1500_v35 = vpop.f32.mrf.mxu1 }
 0x4b1   : > { %v1501_v36 = vadd.f32 %v1500_v35, %v1430_v34  ;;  %v2464_v34 = vld [vmem:[%s2757_s27 + $0x30] sm:$0xff] }
 0x4b2   : > { %v2013_v37 = vpop.f32.mrf.mxu1 }
 0x4b3   : > { %v1504_v39 = vmax.f32 %v1501_v36, 0.0 }
 0x4b5   : > { %2014 = vmatprep.subr.msk.mxu1 %vm1526_vm12, %v1504_v39 }
 0x4b6   : > { %2015 = vmatpush3.msk.msra.mxu1 %vm1526_vm12, %v1504_v39 }
 0x4b7   : > { %2017 = vmatmul.mubr.msk.f32.vlgmr.msra.gmra.mxu1 %vm1513_vm11, %v1506_v38 }
 0x4b8   : > { %2019 = vmatprep.mubr.msk.f32.mxu1 %vm1513_vm11, %v1507_v24 }
 0x4bb   : > { %2020 = vmatmul.mubr.msk.f32.gmra.mxu1 %vm1513_vm11, %v1508_v42 }
 0x577   : > { %v2018_v43 = vpop.f32.mrf.mxu1 }
 0x578   : > { %v1602_v30 = vadd.f32 %v2018_v43, %v1510_v19 }
 0x579   : > { %v1596_v40 = vpop.f32.mrf.mxu1 }
 0x57a   : > { %v1983_v44 = vmul.f32 -1.442695, %v1602_v30  ;;  %v1597_v46 = vadd.f32 %v1596_v40, %v1509_v20 }
 0x57b   : > { %v2021_v0 = vpop.f32.mrf.mxu1 }
 0x57c   : > { %2442 = vpow2.f32 %v1983_v44  ;;  %v1982_v1 = vmul.f32 -1.442695, %v1597_v46  ;;  %v1612_v31 = vadd.f32 %v2021_v0, %v1512_v26 }
 0x57d   : > { %v1606_v8 = vpop.f32.mrf.mxu1 }
 0x57e   : > { %2444 = vpow2.f32 %v1982_v1  ;;  %v1985_v9 = vmul.f32 -1.442695, %v1612_v31  ;;  %v1607_v13 = vadd.f32 %v1606_v8, %v1511_v41 }
 0x580   : > { %2446 = vpow2.f32 %v1985_v9  ;;  %v1984_v2 = vmul.f32 -1.442695, %v1607_v13 }
 0x582   : > { %2448 = vpow2.f32 %v1984_v2 }
 0x589   : > { %v2443_v4 = vpop.eup %2442 }
 0x58a   : > { %v1628_v32 = vadd.f32 1.0, %v2443_v4 }
 0x58b   : > { %v2445_v47 = vpop.eup %2444 }
 0x58c   : > { %2450 = vrcp.f32 %v1628_v32  ;;  %v1627_v12 = vadd.f32 1.0, %v2445_v47 }
 0x58d   : > { %v2447_v48 = vpop.eup %2446 }
 0x58e   : > { %2452 = vrcp.f32 %v1627_v12  ;;  %v1630_v50 = vadd.f32 1.0, %v2447_v48 }
 0x58f   : > { %v2449_v51 = vpop.eup %2448 }
 0x590   : > { %v1629_v52 = vadd.f32 1.0, %v2449_v51  ;;  %2454 = vrcp.f32 %v1630_v50 }
 0x592   : > { %2456 = vrcp.f32 %v1629_v52 }
 0x599   : > { %v2451_v54 = vpop.eup %2450 }
 0x59a   : > { %1646 = vperm.xlu1 %2265, %v2451_v54  }
 0x59b   : > { %v2453_v55 = vpop.eup %2452 }
 0x59c   : > { %1641 = vperm.xlu0 %2264, %v2453_v55  }
 0x59d   : > { %v2455_v59 = vpop.eup %2454 }
 0x59f   : > { %v2457_v60 = vpop.eup %2456 }
 0x5a0   : > { %1651 = vperm.xlu1 %2265, %v2457_v60   ;;  %1656 = vperm.xlu0 %2264, %v2455_v59  }
 0x615   : > { %v1647_v61 = vpop.permute.xlu1 %1646 }
 0x616   : > { %v1661_v62 = vmul.f32 %v1647_v61, %v3400_v7  ;;  %v1662_v63 = vmul.f32 %v1647_v61, %v3396_v53  ;;  %v2461_v7 = vld [vmem:[%s2757_s27 + $0x8] sm:$0xff] }
 0x617   : > { %v1642_v57 = vpop.permute.xlu0 %1641 }
 0x618   : > { %v1669_v45 = vadd.f32 %v2458_v3, %v1661_v62  ;;  %v1670_v16 = vadd.f32 %v2459_v15, %v1662_v63  ;;  %v1659_v18 = vmul.f32 %v1642_v57, %v3412_v17  ;;  %v1660_v49 = vmul.f32 %v1642_v57, %v3406_v14 }
 0x61a   : > { %1677 = vst [vmem:[%s355_s17 + $0x10] sm:$0xff] %v1669_v45  ;;  %1678 = vst [vmem:[%s355_s17 + $0x18] sm:$0xff] %v1670_v16  ;;  %v1667_v22 = vadd.f32 %v2460_v21, %v1659_v18  ;;  %v1668_v25 = vadd.f32 %v2461_v7, %v1660_v49 }
 0x61b   : > { %v1652_v53 = vpop.permute.xlu1 %1651  ;;  %v1657_v23 = vpop.permute.xlu0 %1656 }
 0x61c   : > { %1675 = vst [vmem:[%s355_s17] sm:$0xff] %v1667_v22  ;;  %1676 = vst [vmem:[%s355_s17 + $0x8] sm:$0xff] %v1668_v25  ;;  %v1663_v17 = vmul.f32 %v1652_v53, %v3392_v56  ;;  %v1664_v14 = vmul.f32 %v1652_v53, %v3394_v58  ;;  %v1665_v27 = vmul.f32 %v1657_v23, %v3402_v10  ;;  %v2465_v56 = vld [vmem:[%s2757_s27 + $0x38] sm:$0xff]  ;;  %s2522_s27 = sshll.u32 %s2611_s28, 4  ;;  %s2523_s27 = int_to_ptr.vmem [resolvable:$false] %s2522_s27 }
 0x61d   : > { %v1666_v28 = vmul.f32 %v1657_v23, %v3404_v11  ;;  %s2524_s16 = scalar_lea.vmem %s2523_s27, 2048  ;;  %p2525_p11 = scmp.lt.s32.totalorder %s3472_s25, %s2523_s27 }
 0x61e   : > { %v1671_v6 = vadd.f32 %v2462_v5, %v1663_v17  ;;  %v1672_v33 = vadd.f32 %v2463_v29, %v1664_v14  ;;  %v1673_v35 = vadd.f32 %v2464_v34, %v1665_v27  ;;  %p2526_p0 = scmp.lt.s32.totalorder %s2524_s16, %s2518_s21 }
 0x61f   : > { %v1674_v36 = vadd.f32 %v2465_v56, %v1666_v28 }
 0x620   : > { %1679 = vst [vmem:[%s355_s17 + $0x20] sm:$0xff] %v1671_v6  ;;  %1680 = vst [vmem:[%s355_s17 + $0x28] sm:$0xff] %v1672_v33  ;;  %p2527_p1 = por %p2526_p0, %p2525_p11 }
 0x621   : > { %1681 = vst [vmem:[%s355_s17 + $0x30] sm:$0xff] %v1673_v35  ;;  %1682 = vst [vmem:[%s355_s17 + $0x38] sm:$0xff] %v1674_v36 }
 0x622   : > { %p2528_p3 = pnand %p2527_p1, %p2521_p8 }
 0x624   : > { %2531 = shalt.err (!%p2528_p3)
}
 0x625   : > { %s2532_s29 = scalar_lea.hbm %s3466_s26, 1024  ;;  %s2536_s23 = scalar_lea.hbm %s3526_s9, 2048 }
 0x626   : > { %p2533_p2 = scmp.ne.s32.totalorder %s3466_s26, %s2532_s29  ;;  %p2537_p7 = scmp.lt.s32.totalorder %s3466_s26, %s3526_s9 }
 0x627   : > { %p2538_p6 = scmp.lt.s32.totalorder %s2536_s23, %s2532_s29 }
 0x628   : > { %p2534_p4 = pnand %p2533_p2, %p2701_p5 }
 0x629   : > { %p2539_p9 = por %p2538_p6, %p2537_p7 }
 0x62a   : > { %p2535_p13 = pneg %p2534_p4 }
 0x62c   : > { %p2540_p10 = pnand %p2539_p9, %p2535_p13 }
 0x62e   : > { %2543 = shalt.err (!%p2540_p10)
}
 0x62f   : > { %s2612_s21 = smov 256  }
 0x630   : > { %2030 = dma.vmem_to_hbm [thread:$0]  (%p2701_p5), %s3472_s25, 1024, %s3466_s26, %s3476_s13, %s2612_s21, %s2612_s21, %s2594_s14  }
 0x631 PF: > { %p2047_p12 = scmp.ge.s32.totalorder %s2586_s12, 2  ;;  %s1712_s27 = sand.u32 1, %s2574_s30  }
 0x632   : > { %p3560_p8 = scmp.ne.s32.totalorder %s3529_s20, 0  ;;  %s1713_s16 = scalar_lea.sflag [#allocation4], %s1712_s27 }
 0x634   : > { %p2040_p11 = pnand %p2047_p12, %p3560_p8 }
 0x636   : > { %p2041_p0 = pneg %p2040_p11 }
 0x638   : > { %2569 = dma.done.wait (%p2041_p0), %s1713_s16, 1024  }
 0x639   : > { %2571 = vsyncadd (%p2041_p0), %s1713_s16, 4294966272  ;;  %p21_p1 = scmp.ge.s32.totalorder %s2688_s15, 4   ;;  %s3561_s30 = smov %s2578_s10 }
 0x63a   : > { %s3562_s10 = smov %s2582_s11  ;;  %s3563_s11 = smov %s2699_s18 }
 0x63b   : > { %s3564_s12 = smov %s2688_s15  ;;  %23 = sbr.rel (!%p21_p1) target bundleno = 5 (0x5), region = 100 }
 0x640   :  { %1718 = vsyncpa [#allocation3], 1 }
 0x641   :  { %1720 = vsyncpa [#allocation3 + $0x1], 1 }
 0x642   :  { %1721 = vsyncpa [#allocation6], 1 }
 0x643   :  { %1722 = vsyncpa [#allocation4], 1 }
 0x644   :  { %1724 = vsyncpa [#allocation4 + $0x1], 1 }

</bundles_post_ra>
